<compile_context>
chip_gen: v7x
topology: tpu7x:2x2x1
jax: 0.10.0
libtpu: 0.0.40
codegen_flags: <defaults>
</compile_context>

<pallas_src>
import functools

import jax
import jax.numpy as jnp
from jax.experimental import pallas as pl
from jax.experimental.pallas import tpu as pltpu

EPS = 1e-5
LANE = 128


def _round_up(x, m):
    return (x + m - 1) // m * m


def _cdiv(a, b):
    return -(-a // b)


def _ln_relu_linear2_residual(h, e_f32, g, beta, w2, b2, compute_dtype, out_dtype):
    """Shared tail: LayerNorm (single-pass stats) -> ReLU -> Linear2 -> +edge."""
    inv_d = 1.0 / h.shape[-1]
    mu = jnp.sum(h, axis=-1, keepdims=True) * inv_d
    ex2 = jnp.sum(h * h, axis=-1, keepdims=True) * inv_d
    var = jnp.maximum(ex2 - mu * mu, 0.0)          # clamp catastrophic cancel
    h = (h - mu) * jax.lax.rsqrt(var + EPS)        # rsqrt -> EUP slot
    h = h * g + beta
    h = jnp.maximum(h, 0.0)                        # ReLU
    out = jnp.dot(h.astype(compute_dtype), w2,
                  preferred_element_type=jnp.float32) + b2
    return (out + e_f32).astype(out_dtype)


def _edge_update_fused_kernel(idx_ref, e_ref, pi_ref, pj_ref, w1e_ref,
                              b1_ref, g_ref, beta_ref, w2_ref, b2_ref, o_ref,
                              *, compute_dtype):
    """In-kernel gather: one-hot MXU matmul against resident projected tables."""
    e_f32 = e_ref[...]                                   # (tm, EP) f32 residual
    e_mm = e_f32.astype(compute_dtype)
    idx = idx_ref[...]                                   # (tm, 2) int32
    tm = idx.shape[0]
    n_pad = pi_ref.shape[0]

    # Gather + node-slab projection fused into two MXU matmuls (MXU has huge
    # slack since the kernel is HBM-bound).  onehot[r, n] = (n == idx[r]).
    iota = jax.lax.broadcasted_iota(jnp.int32, (tm, n_pad), 1)
    oh_i = (iota == idx[:, 0:1]).astype(compute_dtype)
    oh_j = (iota == idx[:, 1:2]).astype(compute_dtype)
    h = jnp.dot(oh_i, pi_ref[...], preferred_element_type=jnp.float32)
    h = h + jnp.dot(oh_j, pj_ref[...], preferred_element_type=jnp.float32)
    h = h + jnp.dot(e_mm, w1e_ref[...], preferred_element_type=jnp.float32)
    h = h + b1_ref[...]

    o_ref[...] = _ln_relu_linear2_residual(
        h, e_f32, g_ref[...], beta_ref[...], w2_ref[...], b2_ref[...],
        compute_dtype, o_ref.dtype)


def _edge_update_stream_kernel(nij_ref, e_ref, w1n_ref, w1e_ref,
                               b1_ref, g_ref, beta_ref, w2_ref, b2_ref, o_ref,
                               *, compute_dtype):
    """Fallback: nodes gathered by XLA, streamed as one (E, 2*node_dim) slab."""
    e_f32 = e_ref[...]
    e_mm = e_f32.astype(compute_dtype)
    h = jnp.dot(nij_ref[...], w1n_ref[...], preferred_element_type=jnp.float32)
    h = h + jnp.dot(e_mm, w1e_ref[...], preferred_element_type=jnp.float32)
    h = h + b1_ref[...]
    o_ref[...] = _ln_relu_linear2_residual(
        h, e_f32, g_ref[...], beta_ref[...], w2_ref[...], b2_ref[...],
        compute_dtype, o_ref.dtype)


def sparse_edge_update(node_feats, edge_feats, edge_index, params, *,
                       tm=1024, use_bf16=False, out_dtype=jnp.float32,
                       gather_in_kernel=None):
    """node_feats: (N, node_dim), edge_feats: (E, edge_dim), edge_index: (2, E)
    int32.  Weights stored as (in, out) == torch W.T."""
    w1, b1, gamma, beta, w2, b2 = params
    E, edge_dim = edge_feats.shape
    N, node_dim = node_feats.shape
    input_dim = 2 * node_dim + edge_dim
    assert w1.shape == (input_dim, input_dim)
    assert w2.shape == (input_dim, edge_dim)

    compute_dtype = jnp.bfloat16 if use_bf16 else jnp.float32
    out_dtype = jnp.dtype(out_dtype)
    itm = jnp.dtype(compute_dtype).itemsize
    row_gran = 16 if (use_bf16 or out_dtype.itemsize < 4) else 8

    # --- row tiling: large tile (amortize per-step overhead), but keep >= 2
    # grid steps so both v7x TensorCores are used via the "parallel" axis. ---
    tm = max(row_gran, _round_up(tm, row_gran))
    half_rows = _round_up(_cdiv(_round_up(E, row_gran), 2), row_gran)
    tm_eff = max(row_gran, min(tm, half_rows))
    E_pad = _round_up(E, tm_eff)

    EP = _round_up(edge_dim, LANE)                 # lane-dense edge/output axis
    N_pad = _round_up(N, LANE)

    if gather_in_kernel is None:
        # One-hot gather FLOPs scale with N; only use it when the projected
        # node tables are small enough to sit resident in VMEM cheaply.
        gather_in_kernel = (N_pad <= 2048 and
                            2 * N_pad * input_dim * itm <= (8 << 20))

    def pad_rows(x):
        if x.shape[0] == E_pad:
            return x
        return jnp.pad(x, ((0, E_pad - x.shape[0]), (0, 0)))

    # Edge stream stays f32 (residual path / LN accuracy), lane-padded to EP.
    edge_p = edge_feats.astype(jnp.float32)
    if EP != edge_dim:
        edge_p = jnp.pad(edge_p, ((0, 0), (0, EP - edge_dim)))
    edge_p = pad_rows(edge_p)
    fresh_edge_buf = (EP != edge_dim) or (E_pad != E) or (edge_feats.dtype != jnp.float32)

    # --- weights: split W1 by input chunk; pad edge-facing dims to EP ---
    w1e = jnp.pad(w1[2 * node_dim:, :],
                  ((0, EP - edge_dim), (0, 0))).astype(compute_dtype)       # (EP, in)
    w2p = jnp.pad(w2, ((0, 0), (0, EP - edge_dim))).astype(compute_dtype)   # (in, EP)
    b1_2d = b1.reshape(1, input_dim).astype(jnp.float32)
    g_2d = gamma.reshape(1, input_dim).astype(jnp.float32)
    be_2d = beta.reshape(1, input_dim).astype(jnp.float32)
    b2_2d = jnp.pad(b2, (0, EP - edge_dim)).reshape(1, EP).astype(jnp.float32)

    grid = (E_pad // tm_eff,)
    row_spec = lambda d: pl.BlockSpec((tm_eff, d), lambda i: (i, 0))
    res_spec = lambda r, c: pl.BlockSpec((r, c), lambda i: (0, 0))   # resident

    # Alias the (fresh, padded) edge buffer as the output only when dtypes match.
    alias = {1: 0} if (fresh_edge_buf and out_dtype == jnp.dtype(jnp.float32)) else {}

    resident_w_bytes = (w1e.size + w2p.size) * itm + \
        (b1_2d.size + g_2d.size + be_2d.size + b2_2d.size) * 4
    stream_bytes = 2 * tm_eff * EP * 4 + 2 * tm_eff * EP * out_dtype.itemsize
    temp_bytes = 6 * tm_eff * input_dim * 4

    if gather_in_kernel:
        # Pre-project the node table through the two node slabs of W1 once
        # (tiny N x input_dim matmuls, done by XLA); tables stay VMEM-resident.
        nf32 = node_feats.astype(jnp.float32)
        pi = nf32 @ w1[:node_dim, :].astype(jnp.float32)
        pj = nf32 @ w1[node_dim:2 * node_dim, :].astype(jnp.float32)
        pi = jnp.pad(pi, ((0, N_pad - N), (0, 0))).astype(compute_dtype)
        pj = jnp.pad(pj, ((0, N_pad - N), (0, 0))).astype(compute_dtype)
        idx2 = pad_rows(edge_index.T.astype(jnp.int32))       # (E_pad, 2)
        # Padded rows read node 0 and get sliced off afterwards (benign).

        need = (stream_bytes
                + 2 * tm_eff * 2 * 4                      # idx stream (dbl-buf)
                + 2 * ((pi.size + pj.size) * itm + resident_w_bytes)
                + 2 * tm_eff * N_pad * max(itm, 4)        # one-hot temporaries
                + temp_bytes)
        kernel = functools.partial(_edge_update_fused_kernel,
                                   compute_dtype=compute_dtype)
        operands = (idx2, edge_p, pi, pj, w1e, b1_2d, g_2d, be_2d, w2p, b2_2d)
        in_specs = [
            row_spec(2),                      # edge_index rows, (tm, 2) int32
            row_spec(EP),                     # edge feats (lane-dense)
            res_spec(N_pad, input_dim),       # P_i  = node_feats @ W1[:nd]
            res_spec(N_pad, input_dim),       # P_j  = node_feats @ W1[nd:2nd]
            res_spec(EP, input_dim),          # W1 edge slab
            res_spec(1, input_dim),           # b1
            res_spec(1, input_dim),           # gamma
            res_spec(1, input_dim),           # beta
            res_spec(input_dim, EP),          # W2 (lane-padded cols)
            res_spec(1, EP),                  # b2
        ]
    else:
        # Fallback: XLA gather, fused into one lane-dense (E, 2*node_dim) slab.
        nodes_ij = jnp.concatenate(
            [jnp.take(node_feats, edge_index[0], axis=0),
             jnp.take(node_feats, edge_index[1], axis=0)], axis=-1)
        nodes_ij = pad_rows(nodes_ij.astype(compute_dtype))
        w1n = w1[:2 * node_dim, :].astype(compute_dtype)       # (2*nd, in)

        need = (stream_bytes
                + 2 * tm_eff * 2 * node_dim * itm          # nodes_ij stream
                + 2 * (w1n.size * itm + resident_w_bytes)
                + temp_bytes)
        kernel = functools.partial(_edge_update_stream_kernel,
                                   compute_dtype=compute_dtype)
        operands = (nodes_ij, edge_p, w1n, w1e, b1_2d, g_2d, be_2d, w2p, b2_2d)
        in_specs = [
            row_spec(2 * node_dim),           # nodes_ij (lane-dense)
            row_spec(EP),                     # edge feats (lane-dense)
            res_spec(2 * node_dim, input_dim),
            res_spec(EP, input_dim),
            res_spec(1, input_dim),
            res_spec(1, input_dim),
            res_spec(1, input_dim),
            res_spec(input_dim, EP),
            res_spec(1, EP),
        ]

    # Tight VMEM budget: ~1.5x need, floor 8 MiB, cap 48 MiB (never below need).
    vmem_bytes = int(min(max(int(1.5 * need), 8 << 20), 48 << 20))
    vmem_bytes = max(vmem_bytes, int(need))

    out_p = pl.pallas_call(
        kernel,
        out_shape=jax.ShapeDtypeStruct((E_pad, EP), out_dtype),
        grid_spec=pltpu.PrefetchScalarGridSpec(
            num_scalar_prefetch=0,
            grid=grid,
            in_specs=in_specs,
            out_specs=row_spec(EP),
        ),
        input_output_aliases=alias,
        compiler_params=pltpu.CompilerParams(
            dimension_semantics=("parallel",),
            vmem_limit_bytes=vmem_bytes),
    )(*operands)

    return out_p[:E, :edge_dim]


def reference(node_feats, edge_feats, edge_index, params):
    w1, b1, gamma, beta, w2, b2 = params
    node_i = node_feats[edge_index[0]]
    node_j = node_feats[edge_index[1]]
    x = jnp.concatenate([node_i, node_j, edge_feats], axis=-1)
    h = x @ w1 + b1
    mu = jnp.mean(h, axis=-1, keepdims=True)
    var = jnp.mean(jnp.square(h - mu), axis=-1, keepdims=True)
    h = (h - mu) / jnp.sqrt(var + EPS) * gamma + beta
    h = jnp.maximum(h, 0.0)
    return h @ w2 + b2 + edge_feats


if __name__ == "__main__":
    node_dim = 64
    edge_dim = 64
    input_dim = 2 * node_dim + edge_dim   # 192
    N = 32      # nodes
    E = 128     # edges

    key = jax.random.PRNGKey(0)
    k_node, k_edge, k_idx, k_w1, k_b1, k_w2, k_b2 = jax.random.split(key, 7)

    node_feats = jax.random.normal(k_node, (N, node_dim), jnp.float32)
    edge_feats = jax.random.normal(k_edge, (E, edge_dim), jnp.float32)
    edge_index = jax.random.randint(k_idx, (2, E), 0, N, jnp.int32)

    # deterministic synthetic parameters (stored as (in, out), i.e. torch W.T)
    w1 = jax.random.normal(k_w1, (input_dim, input_dim), jnp.float32) * 0.05
    b1 = jax.random.normal(k_b1, (input_dim,), jnp.float32) * 0.01
    gamma = jnp.ones((input_dim,), jnp.float32)
    beta = jnp.zeros((input_dim,), jnp.float32)
    w2 = jax.random.normal(k_w2, (input_dim, edge_dim), jnp.float32) * 0.05
    b2 = jax.random.normal(k_b2, (edge_dim,), jnp.float32) * 0.01
    params = (w1, b1, gamma, beta, w2, b2)

    ref = reference(node_feats, edge_feats, edge_index, params)

    # 1) f32, in-kernel one-hot gather path (default for small node tables)
    out = sparse_edge_update(node_feats, edge_feats, edge_index, params)
    out = jax.block_until_ready(out)
    assert out.shape == (E, edge_dim)
    assert jnp.allclose(out, ref, atol=1e-4, rtol=1e-4)

    # 2) f32, streamed-gather fallback path (large-N configuration)
    out_s = sparse_edge_update(node_feats, edge_feats, edge_index, params,
                               gather_in_kernel=False)
    out_s = jax.block_until_ready(out_s)
    assert out_s.shape == (E, edge_dim)
    assert jnp.allclose(out_s, ref, atol=1e-4, rtol=1e-4)

    # 3) bf16 streaming + bf16 output (works on v5e/v6e/v7x; LN + residual
    #    accumulate in f32, cast only at the final store)
    out_bf16 = sparse_edge_update(node_feats, edge_feats, edge_index, params,
                                  use_bf16=True, out_dtype=jnp.bfloat16)
    out_bf16 = jax.block_until_ready(out_bf16)
    assert out_bf16.shape == (E, edge_dim)
    assert out_bf16.dtype == jnp.bfloat16
    assert jnp.allclose(out_bf16.astype(jnp.float32), ref, atol=5e-2, rtol=5e-2)

    print("KERNEL_OK")
</pallas_src>

<mosaic_0001>
module attributes {stable_mosaic.version = 11 : i64} {
  func.func @_edge_update_fused_kernel(%arg0: i32, %arg1: memref<64x2xi32, #tpu.memory_space<vmem>>, %arg2: memref<64x128xf32, #tpu.memory_space<vmem>>, %arg3: memref<128x192xf32, #tpu.memory_space<vmem>>, %arg4: memref<128x192xf32, #tpu.memory_space<vmem>>, %arg5: memref<128x192xf32, #tpu.memory_space<vmem>>, %arg6: memref<1x192xf32, #tpu.memory_space<vmem>>, %arg7: memref<1x192xf32, #tpu.memory_space<vmem>>, %arg8: memref<1x192xf32, #tpu.memory_space<vmem>>, %arg9: memref<192x128xf32, #tpu.memory_space<vmem>>, %arg10: memref<1x128xf32, #tpu.memory_space<vmem>>, %arg11: memref<64x128xf32, #tpu.memory_space<vmem>>) attributes {dimension_semantics = [#tpu.dimension_semantics<parallel>], iteration_bounds = array<i64: 2>, scalar_prefetch = 0 : i64, scratch_operands = 0 : i64, tpu.core_type = #tpu.core_type<tc>, window_params = [{transform_indices = @transform_0, window_bounds = array<i64: 64, 2>}, {transform_indices = @transform_1, window_bounds = array<i64: 64, 128>}, {pipeline_mode = #tpu.pipeline_mode<synchronous>, transform_indices = @transform_2, window_bounds = array<i64: 128, 192>}, {pipeline_mode = #tpu.pipeline_mode<synchronous>, transform_indices = @transform_3, window_bounds = array<i64: 128, 192>}, {pipeline_mode = #tpu.pipeline_mode<synchronous>, transform_indices = @transform_4, window_bounds = array<i64: 128, 192>}, {pipeline_mode = #tpu.pipeline_mode<synchronous>, transform_indices = @transform_5, window_bounds = array<i64: 1, 192>}, {pipeline_mode = #tpu.pipeline_mode<synchronous>, transform_indices = @transform_6, window_bounds = array<i64: 1, 192>}, {pipeline_mode = #tpu.pipeline_mode<synchronous>, transform_indices = @transform_7, window_bounds = array<i64: 1, 192>}, {pipeline_mode = #tpu.pipeline_mode<synchronous>, transform_indices = @transform_8, window_bounds = array<i64: 192, 128>}, {pipeline_mode = #tpu.pipeline_mode<synchronous>, transform_indices = @transform_9, window_bounds = array<i64: 1, 128>}, {transform_indices = @transform_10, window_bounds = array<i64: 64, 128>}]} {
    %c0 = arith.constant 0 : index
    %c0_0 = arith.constant 0 : index
    %0 = vector.load %arg2[%c0, %c0_0] : memref<64x128xf32, #tpu.memory_space<vmem>>, vector<64x128xf32>
    %c0_1 = arith.constant 0 : index
    %c0_2 = arith.constant 0 : index
    %1 = vector.load %arg1[%c0_1, %c0_2] : memref<64x2xi32, #tpu.memory_space<vmem>>, vector<64x2xi32>
    %2 = tpu.iota {dimensions = array<i32: 1>} : vector<64x128xi32>
    %3 = vector.extract_strided_slice %1 {offsets = [0, 0], sizes = [64, 1], strides = [1, 1]} : vector<64x2xi32> to vector<64x1xi32>
    %4 = vector.broadcast %3 : vector<64x1xi32> to vector<64x128xi32>
    %5 = arith.cmpi eq, %2, %4 : vector<64x128xi32>
    %6 = arith.extui %5 : vector<64x128xi1> to vector<64x128xi32>
    %7 = arith.sitofp %6 : vector<64x128xi32> to vector<64x128xf32>
    %8 = vector.extract_strided_slice %1 {offsets = [0, 1], sizes = [64, 1], strides = [1, 1]} : vector<64x2xi32> to vector<64x1xi32>
    %9 = vector.broadcast %8 : vector<64x1xi32> to vector<64x128xi32>
    %10 = arith.cmpi eq, %2, %9 : vector<64x128xi32>
    %11 = arith.extui %10 : vector<64x128xi1> to vector<64x128xi32>
    %12 = arith.sitofp %11 : vector<64x128xi32> to vector<64x128xf32>
    %c0_3 = arith.constant 0 : index
    %c0_4 = arith.constant 0 : index
    %13 = vector.load %arg3[%c0_3, %c0_4] : memref<128x192xf32, #tpu.memory_space<vmem>>, vector<128x192xf32>
    %cst = arith.constant dense<0.000000e+00> : vector<64x192xf32>
    %14 = tpu.matmul %7, %13, %cst {dimension_numbers = #tpu.dot_dimension_numbers<[1], [0], [0], [1], [0, 0, 1, 1], [], []>} : vector<64x128xf32>, vector<128x192xf32>, vector<64x192xf32> -> vector<64x192xf32>
    %c0_5 = arith.constant 0 : index
    %c0_6 = arith.constant 0 : index
    %15 = vector.load %arg4[%c0_5, %c0_6] : memref<128x192xf32, #tpu.memory_space<vmem>>, vector<128x192xf32>
    %cst_7 = arith.constant dense<0.000000e+00> : vector<64x192xf32>
    %16 = tpu.matmul %12, %15, %cst_7 {dimension_numbers = #tpu.dot_dimension_numbers<[1], [0], [0], [1], [0, 0, 1, 1], [], []>} : vector<64x128xf32>, vector<128x192xf32>, vector<64x192xf32> -> vector<64x192xf32>
    %17 = arith.addf %14, %16 : vector<64x192xf32>
    %c0_8 = arith.constant 0 : index
    %c0_9 = arith.constant 0 : index
    %18 = vector.load %arg5[%c0_8, %c0_9] : memref<128x192xf32, #tpu.memory_space<vmem>>, vector<128x192xf32>
    %cst_10 = arith.constant dense<0.000000e+00> : vector<64x192xf32>
    %19 = tpu.matmul %0, %18, %cst_10 {dimension_numbers = #tpu.dot_dimension_numbers<[1], [0], [0], [1], [0, 0, 1, 1], [], []>} : vector<64x128xf32>, vector<128x192xf32>, vector<64x192xf32> -> vector<64x192xf32>
    %20 = arith.addf %17, %19 : vector<64x192xf32>
    %c0_11 = arith.constant 0 : index
    %c0_12 = arith.constant 0 : index
    %21 = vector.load %arg6[%c0_11, %c0_12] : memref<1x192xf32, #tpu.memory_space<vmem>>, vector<1x192xf32>
    %22 = vector.broadcast %21 : vector<1x192xf32> to vector<64x192xf32>
    %23 = arith.addf %20, %22 : vector<64x192xf32>
    %c0_13 = arith.constant 0 : index
    %c0_14 = arith.constant 0 : index
    %24 = vector.load %arg7[%c0_13, %c0_14] : memref<1x192xf32, #tpu.memory_space<vmem>>, vector<1x192xf32>
    %c0_15 = arith.constant 0 : index
    %c0_16 = arith.constant 0 : index
    %25 = vector.load %arg8[%c0_15, %c0_16] : memref<1x192xf32, #tpu.memory_space<vmem>>, vector<1x192xf32>
    %c0_17 = arith.constant 0 : index
    %c0_18 = arith.constant 0 : index
    %26 = vector.load %arg9[%c0_17, %c0_18] : memref<192x128xf32, #tpu.memory_space<vmem>>, vector<192x128xf32>
    %c0_19 = arith.constant 0 : index
    %c0_20 = arith.constant 0 : index
    %27 = vector.load %arg10[%c0_19, %c0_20] : memref<1x128xf32, #tpu.memory_space<vmem>>, vector<1x128xf32>
    %cst_21 = arith.constant dense<0.000000e+00> : vector<64xf32>
    %28 = vector.multi_reduction <add>, %23, %cst_21 [1] : vector<64x192xf32> to vector<64xf32>
    %29 = vector.shape_cast %28 : vector<64xf32> to vector<64x1xf32>
    %cst_22 = arith.constant 0.00520833349 : f32
    %30 = vector.broadcast %cst_22 : f32 to vector<64x1xf32>
    %31 = arith.mulf %29, %30 : vector<64x1xf32>
    %32 = arith.mulf %23, %23 : vector<64x192xf32>
    %cst_23 = arith.constant dense<0.000000e+00> : vector<64xf32>
    %33 = vector.multi_reduction <add>, %32, %cst_23 [1] : vector<64x192xf32> to vector<64xf32>
    %34 = vector.shape_cast %33 : vector<64xf32> to vector<64x1xf32>
    %cst_24 = arith.constant 0.00520833349 : f32
    %35 = vector.broadcast %cst_24 : f32 to vector<64x1xf32>
    %36 = arith.mulf %34, %35 : vector<64x1xf32>
    %37 = arith.mulf %31, %31 : vector<64x1xf32>
    %38 = arith.subf %36, %37 : vector<64x1xf32>
    %cst_25 = arith.constant 0.000000e+00 : f32
    %39 = vector.broadcast %cst_25 : f32 to vector<64x1xf32>
    %40 = arith.maximumf %38, %39 : vector<64x1xf32>
    %41 = vector.broadcast %31 : vector<64x1xf32> to vector<64x192xf32>
    %42 = arith.subf %23, %41 : vector<64x192xf32>
    %cst_26 = arith.constant 9.99999974E-6 : f32
    %43 = vector.broadcast %cst_26 : f32 to vector<64x1xf32>
    %44 = arith.addf %40, %43 : vector<64x1xf32>
    %45 = math.rsqrt %44 : vector<64x1xf32>
    %46 = vector.broadcast %45 : vector<64x1xf32> to vector<64x192xf32>
    %47 = arith.mulf %42, %46 : vector<64x192xf32>
    %48 = vector.broadcast %24 : vector<1x192xf32> to vector<64x192xf32>
    %49 = arith.mulf %47, %48 : vector<64x192xf32>
    %50 = vector.broadcast %25 : vector<1x192xf32> to vector<64x192xf32>
    %51 = arith.addf %49, %50 : vector<64x192xf32>
    %cst_27 = arith.constant 0.000000e+00 : f32
    %52 = vector.broadcast %cst_27 : f32 to vector<64x192xf32>
    %53 = arith.maximumf %51, %52 : vector<64x192xf32>
    %cst_28 = arith.constant dense<0.000000e+00> : vector<64x128xf32>
    %54 = tpu.matmul %53, %26, %cst_28 {dimension_numbers = #tpu.dot_dimension_numbers<[1], [0], [0], [1], [0, 0, 1, 1], [], []>} : vector<64x192xf32>, vector<192x128xf32>, vector<64x128xf32> -> vector<64x128xf32>
    %55 = vector.broadcast %27 : vector<1x128xf32> to vector<64x128xf32>
    %56 = arith.addf %54, %55 : vector<64x128xf32>
    %57 = arith.addf %56, %0 : vector<64x128xf32>
    %c0_29 = arith.constant 0 : index
    %c0_30 = arith.constant 0 : index
    %58 = vector.load %arg11[%c0_29, %c0_30] : memref<64x128xf32, #tpu.memory_space<vmem>>, vector<64x128xf32>
    tpu.vector_store %arg11[%c0_29, %c0_30], %57 {strides = array<i32>} : memref<64x128xf32, #tpu.memory_space<vmem>>, vector<64x128xf32>,
    return
  }
  func.func @transform_0(%arg0: i32) -> (i32, i32) {
    %c0_i32 = arith.constant 0 : i32
    %c0_i32_0 = arith.constant 0 : i32
    return %arg0, %c0_i32 : i32, i32
  }
  func.func @transform_1(%arg0: i32) -> (i32, i32) {
    %c0_i32 = arith.constant 0 : i32
    %c0_i32_0 = arith.constant 0 : i32
    return %arg0, %c0_i32 : i32, i32
  }
  func.func @transform_2(%arg0: i32) -> (i32, i32) {
    %c0_i32 = arith.constant 0 : i32
    %c0_i32_0 = arith.constant 0 : i32
    %c0_i32_1 = arith.constant 0 : i32
    return %c0_i32, %c0_i32_0 : i32, i32
  }
  func.func @transform_3(%arg0: i32) -> (i32, i32) {
    %c0_i32 = arith.constant 0 : i32
    %c0_i32_0 = arith.constant 0 : i32
    %c0_i32_1 = arith.constant 0 : i32
    return %c0_i32, %c0_i32_0 : i32, i32
  }
  func.func @transform_4(%arg0: i32) -> (i32, i32) {
    %c0_i32 = arith.constant 0 : i32
    %c0_i32_0 = arith.constant 0 : i32
    %c0_i32_1 = arith.constant 0 : i32
    return %c0_i32, %c0_i32_0 : i32, i32
  }
  func.func @transform_5(%arg0: i32) -> (i32, i32) {
    %c0_i32 = arith.constant 0 : i32
    %c0_i32_0 = arith.constant 0 : i32
    %c0_i32_1 = arith.constant 0 : i32
    return %c0_i32, %c0_i32_0 : i32, i32
  }
  func.func @transform_6(%arg0: i32) -> (i32, i32) {
    %c0_i32 = arith.constant 0 : i32
    %c0_i32_0 = arith.constant 0 : i32
    %c0_i32_1 = arith.constant 0 : i32
    return %c0_i32, %c0_i32_0 : i32, i32
  }
  func.func @transform_7(%arg0: i32) -> (i32, i32) {
    %c0_i32 = arith.constant 0 : i32
    %c0_i32_0 = arith.constant 0 : i32
    %c0_i32_1 = arith.constant 0 : i32
    return %c0_i32, %c0_i32_0 : i32, i32
  }
  func.func @transform_8(%arg0: i32) -> (i32, i32) {
    %c0_i32 = arith.constant 0 : i32
    %c0_i32_0 = arith.constant 0 : i32
    %c0_i32_1 = arith.constant 0 : i32
    return %c0_i32, %c0_i32_0 : i32, i32
  }
  func.func @transform_9(%arg0: i32) -> (i32, i32) {
    %c0_i32 = arith.constant 0 : i32
    %c0_i32_0 = arith.constant 0 : i32
    %c0_i32_1 = arith.constant 0 : i32
    return %c0_i32, %c0_i32_0 : i32, i32
  }
  func.func @transform_10(%arg0: i32) -> (i32, i32) {
    %c0_i32 = arith.constant 0 : i32
    %c0_i32_0 = arith.constant 0 : i32
    return %arg0, %c0_i32 : i32, i32
  }
}

</mosaic_0001>

<bundles_post_ra>
// kernel: tpu_custom_call.1
= control target key start
LH: loop header
LB: loop body
LE: loop exit
PB: predicated region body
PF: predicated region fallthrough
CT: control target
= control target key end

     0   :  { %s2920_s0 = inlined_call_operand.vmem [shape: s32[128,2], index: 0, kind: input, shape index: {}]   ;;  %s2921_s1 = inlined_call_operand.hbm [shape: f32[128,128], index: 1, kind: input, shape index: {}, may-alias: {1,10}]   ;;  %s2922_s2 = inlined_call_operand.vmem [shape: f32[128,192], index: 2, kind: input, shape index: {}]   ;;  %s2923_s3 = inlined_call_operand.vmem [shape: f32[128,192], index: 3, kind: input, shape index: {}]   ;;  %s2924_s4 = inlined_call_operand.vmem [shape: f32[128,192], index: 4, kind: input, shape index: {}]   ;;  %s2925_s5 = inlined_call_operand.vmem [shape: f32[1,192], index: 5, kind: input, shape index: {}]   ;;  %s2926_s6 = inlined_call_operand.vmem [shape: f32[1,192], index: 6, kind: input, shape index: {}]   ;;  %s2927_s7 = inlined_call_operand.vmem [shape: f32[1,192], index: 7, kind: input, shape index: {}]   ;;  %s2928_s8 = inlined_call_operand.vmem [shape: f32[192,128], index: 8, kind: input, shape index: {}]   ;;  %s2929_s9 = inlined_call_operand.vmem [shape: f32[1,128], index: 9, kind: input, shape index: {}]   ;;  %s2930_s10 = inlined_call_operand.hbm [shape: f32[128,128], index: 10, kind: output, shape index: {}, may-alias: {1,10}]  }
   0x1   :  { %2933 = sst [smem:[#allocation9_spill]] %s2920_s0 }
   0x2   :  { %15 = vsyncpa [#allocation3], 0 }
   0x3   :  { %17 = vsyncpa [#allocation3 + $0x1], 0 }
   0x4   :  { %18 = vsyncpa [#allocation4], 0 }
   0x5   :  { %20 = vsyncpa [#allocation4 + $0x1], 0  ;;  %s1973_s13 = smov 0   ;;  %s1975_s14 = smov 0  }
   0x6   :  { %s1977_s15 = smov 0   ;;  %s1979_s16 = smov 0  }
   0x7 LB: > { %s1994_s17 = sadd.s32 4294967295, %s1905_s16   ;;  %s1511_s18 = sadd.s32 4294967294, %s1905_s16   ;;  %s1905_s16 = sphi %s1979_s16, %s2949_s16   ;;  %s1901_s15 = sphi %s1977_s15, %s2948_s15   ;;  %s1897_s14 = sphi %s1975_s14, %s2947_s14   ;;  %s1893_s13 = sphi %s1973_s13, %s2946_s13  }
   0x8   : > { %s1998_s19 = sadd.s32 1, %s1905_s16   ;;  %s59_s20 = sadd.s32 1, %s1901_s15 }
   0x9   : > { %s56_s21 = ssub.s32 %s1905_s16, %s1998_s19  ;;  %p66_p0 = scmp.ne.s32.totalorder %s1901_s15, %s1897_s14 }
   0xa   : > { %p57_p1 = scmp.eq.s32.totalorder %s56_s21, 0  ;;  %p67_p2 = scmp.eq.s32.totalorder %s1905_s16, 0 }
   0xb   : > { %p72_p3 = scmp.ne.s32.totalorder %s1897_s14, %s1893_s13  ;;  %p73_p4 = scmp.eq.s32.totalorder %s1994_s17, 0 }
   0xc   : > { %s2010_s22 = scalar_select %p57_p1, %s1901_s15, %s59_s20  }
   0xd   : > { %p2012_p5 = por %p67_p2, %p66_p0  ;;  %p2016_p6 = por %p73_p4, %p72_p3 }
   0xe   : > { %2934 = sst [smem:[#allocation8_spill]] %s2010_s22  ;;  %p264_p7 = scmp.eq.s32.totalorder %s1994_s17, 1 }
   0xf   : > { %p270_p8 = scmp.eq.s32.totalorder %s1511_s18, 1  ;;  %p1746_p10 = scmp.lt.s32.totalorder %s1905_s16, 2 }
  0x10   : > { %p2023_p11 = por %p264_p7, %p66_p0  ;;  %s323_s27 = sand.u32 1, %s1901_s15  }
  0x11   : > { %p2027_p12 = por %p270_p8, %p72_p3  ;;  %s1568_s28 = sshll.u32 %s1905_s16, 10 }
  0x12   : > { %s2937_s25 = scalar_select %p2023_p11, 1, 0 }
  0x13   : > { %s2938_s26 = scalar_select %p2027_p12, 1, 0 }
  0x14   : > { %s1514_s29 = sshll.u32 %s323_s27, 6  ;;  %s2036_s12 = scalar_lea.hbm %s2921_s1, %s1568_s28 }
  0x15   : > { %s327_s18 = scalar_lea.vmem [#allocation2], %s1514_s29  ;;  %p2040_p13 = pnand %p1746_p10, %p2012_p5 }
  0x16   : > { %s334_s20 = sshll.u32 %s327_s18, 4  ;;  %s2046_s22 = scalar_lea.sflag [#allocation3], %s323_s27  ;;  %s2044_s20 = int_to_ptr.vmem [resolvable:$true] %s334_s20 }
  0x17   : > { %s1809_s30 = scalar_lea.hbm %s2036_s12, 1024  ;;  %p1811_p1 = pneg %p2040_p13 }
  0x18   : > { %p1810_p0 = scmp.ne.s32.totalorder %s2036_s12, %s1809_s30  ;;  %s1814_s29 = scalar_lea.hbm %s2921_s1, 2048 }
  0x19   : > { %p1815_p4 = scmp.lt.u32.totalorder %s2036_s12, %s2921_s1  ;;  %p1816_p5 = scmp.lt.u32.totalorder %s1814_s29, %s1809_s30 }
  0x1a   : > { %p1812_p2 = pnand %p1811_p1, %p1810_p0  ;;  %p1818_p8 = scmp.lt.u32.totalorder %s1809_s30, %s2036_s12 }
  0x1b   : > { %p1817_p7 = por %p1816_p5, %p1815_p4 }
  0x1c   : > { %p1813_p3 = pneg %p1812_p2 }
  0x1d   : > { %p1819_p10 = por %p1818_p8, %p1817_p7 }
  0x1f   : > { %p1820_p9 = pnand %p1819_p10, %p1813_p3 }
  0x21   : > { %1823 = shalt.err (!%p1820_p9)
}
  0x22   : > { %s1824_s27 = scalar_lea.vmem %s2044_s20, 1024  ;;  %s1907_s28 = smov [#allocation2]  }
  0x23   : > { %p1825_p0 = scmp.ne.s32.totalorder %s2044_s20, %s1824_s27  ;;  %s1829_s23 = sshll.u32 %s1907_s28, 4  ;;  %s1830_s23 = int_to_ptr.vmem [resolvable:$false] %s1829_s23 }
  0x24   : > { %s1831_s11 = scalar_lea.vmem %s1830_s23, 2048  ;;  %p1832_p11 = scmp.lt.s32.totalorder %s2044_s20, %s1830_s23 }
  0x25   : > { %p1827_p2 = pnand %p1825_p0, %p1811_p1  ;;  %p1833_p4 = scmp.lt.s32.totalorder %s1831_s11, %s1824_s27 }
  0x27   : > { %p1828_p12 = pneg %p1827_p2  ;;  %p1834_p5 = por %p1833_p4, %p1832_p11 }
  0x29   : > { %p1835_p7 = pnand %p1834_p5, %p1828_p12 }
  0x2b   : > { %1838 = shalt.err (!%p1835_p7)
}
  0x2c   : > { %s1908_s30 = smov 128   ;;  %s1909_s29 = smov 8  }
  0x2d   : > { %1741 = dma.hbm_to_vmem [thread:$0]  (!%p2040_p13), %s2036_s12, 1024, %s2044_s20, %s2046_s22, %s1908_s30, %s1908_s30, %s1909_s29  }
  0x2e   : > { %p1517_p9 = scmp.ge.s32.totalorder %s1905_s16, 1  ;;  %p342_p1 = scmp.lt.s32.totalorder %s1905_s16, 3 }
  0x30   : > { %p343_p3 = pnand %p1517_p9, %p342_p1 }
  0x31   : > { %s2077_s18 = sand.u32 (!%p343_p3), 1, %s1897_s14  }
  0x32   : > { %346 = sbr.rel (%p343_p3) target bundleno = 880 (0x370), region = 60  ;;  %s2932_s27 = sshll.u32 (!%p343_p3), %s2077_s18, 6 }
  0x33   : > { %s349_s28 = scalar_lea.sflag (!%p343_p3), [#allocation3], %s2077_s18  ;;  %s2083_s23 = scalar_lea.vmem (!%p343_p3), [#allocation2], %s2932_s27 }
  0x39   : > { %1884 = dma.done.wait (%p2016_p6), %s349_s28, 1024  }
  0x3a   : > { %1886 = vsyncadd (%p2016_p6), %s349_s28, 4294966272  ;;  %s1520_s22 = sshll.u32 %s1994_s17, 3  ;;  %v1910_v0 = vmov 0   ;;  %s2940_s0 = sld [smem:[#allocation9_spill]]  ;;  %v517_v5 = vld [vmem:[%s2922_s2 + $0x8] sm:$0xff]  ;;  %v1911_v6 = vmov 0.0  }
  0x3b   : > { %1790 = vset.pattern.permute.xlu1 %v1910_v0  ;;  %1789 = vset.pattern.permute.xlu0 %v1910_v0  ;;  %p395_p11 = scmp.lt.s32.totalorder %s1520_s22, 15  ;;  %v519_v7 = vld [vmem:[%s2922_s2 + $0x18] sm:$0xff]  ;;  %v516_v8 = vld [vmem:[%s2922_s2] sm:$0xff]  ;;  %v518_v9 = vld [vmem:[%s2922_s2 + $0x10] sm:$0xff]  ;;  %v1912_v57 = vmov 1   ;;  %s1569_s21 = sshll.u32 %s1994_s17, 10 }
  0x3c   : > { %757 = vmatprep.mubr.f32.mxu0 %v1911_v6  ;;  %644 = vmatprep.mubr.f32.mxu1 %v1911_v6  ;;  %v1602_v10 = vpack.c.bf16 %v519_v7, %v517_v5  ;;  %v1604_v11 = vpack.c.bf16 %v518_v9, %v516_v8  ;;  %v521_v12 = vld [vmem:[%s2922_s2 + $0x28] sm:$0xff]  ;;  %v523_v13 = vld [vmem:[%s2922_s2 + $0x38] sm:$0xff]  ;;  %v520_v14 = vld [vmem:[%s2922_s2 + $0x20] sm:$0xff]  ;;  %s1413_s27 = scalar_lea.sflag [#allocation4], %s2077_s18  ;;  %p2942_p12 = scmp.ne.s32.totalorder %s2937_s25, 0 }
  0x3d   : > { %s2951_s22 = smov (!%p395_p11, %s1520_s22), 15  ;;  %v1606_v15 = vpack.c.bf16 %v523_v13, %v521_v12  ;;  %v522_v16 = vld [vmem:[%s2922_s2 + $0x30] sm:$0xff]  ;;  %v525_v17 = vld [vmem:[%s2922_s2 + $0x48] sm:$0xff]  ;;  %v527_v18 = vld [vmem:[%s2922_s2 + $0x58] sm:$0xff]  ;;  %s1915_s17 = smov [#allocation5]  }
  0x3e   : > { %s1521_s12 = sshll.u32 %s2951_s22, 3  ;;  %1603 = vmatprep.subr.bf16.mxu0 %v1602_v10  ;;  %v1608_v21 = vpack.c.bf16 %v522_v16, %v520_v14  ;;  %v1610_v23 = vpack.c.bf16 %v527_v18, %v525_v17  ;;  %v524_v24 = vld [vmem:[%s2922_s2 + $0x40] sm:$0xff]  ;;  %v526_v25 = vld [vmem:[%s2922_s2 + $0x50] sm:$0xff]  ;;  %v529_v26 = vld [vmem:[%s2922_s2 + $0x68] sm:$0xff]  ;;  %s2941_s22 = sshll.u32 %s2077_s18, 6 }
  0x3f   : > { %1605 = vmatpush1.bf16.msra.mxu0 %v1604_v11  ;;  %v531_v27 = vld [vmem:[%s2922_s2 + $0x78] sm:$0xff]  ;;  %v549_v28 = vld [vmem:[%s2923_s3 + $0x8] sm:$0xff]  ;;  %v548_v32 = vld [vmem:[%s2923_s3] sm:$0xff]  ;;  %v1612_v34 = vpack.c.bf16 %v526_v25, %v524_v24  ;;  %s1843_s29 = sshll.u32 %s1915_s17, 4  ;;  %s1844_s29 = int_to_ptr.vmem [resolvable:$false] %s1843_s29 }
  0x40   : > { %s2093_s11 = scalar_lea.vmem %s2940_s0, %s1521_s12  ;;  %1607 = vmatprep.subr.bf16.mxu0 %v1606_v15  ;;  %v551_v29 = vld [vmem:[%s2923_s3 + $0x18] sm:$0xff]  ;;  %v550_v33 = vld [vmem:[%s2923_s3 + $0x10] sm:$0xff]  ;;  %v528_v35 = vld [vmem:[%s2922_s2 + $0x60] sm:$0xff]  ;;  %v1614_v38 = vpack.c.bf16 %v531_v27, %v529_v26  ;;  %s2852_s12 = scalar_lea.vmem [#allocation5], %s2941_s22 }
  0x41   : > { %v2096_v1 = vld [vmem:[%s2093_s11 + $0x10] sm:$0xff]  ;;  %v2099_v2 = vld [vmem:[%s2093_s11] sm:$0xff]  ;;  %v2104_v3 = vld [vmem:[%s2093_s11 + $0x18] sm:$0xff]  ;;  %v1570_v31 = vpack.c.bf16 %v551_v29, %v549_v28  ;;  %v1572_v37 = vpack.c.bf16 %v550_v33, %v548_v32  ;;  %s1426_s20 = sshll.u32 %s2852_s12, 4  ;;  %s2868_s20 = int_to_ptr.vmem [resolvable:$true] %s1426_s20 }
  0x42   : > { %427 = vperm.xlu1 %1790, %v2096_v1   ;;  %421 = vperm.xlu0 %1789, %v2099_v2   ;;  %v2107_v4 = vld [vmem:[%s2093_s11 + $0x8] sm:$0xff]  ;;  %v2147_v20 = vld [vmem:[%s2093_s11 + $0x20] sm:$0xff]  ;;  %v2150_v22 = vld [vmem:[%s2093_s11 + $0x38] sm:$0xff]  ;;  %s1839_s30 = scalar_lea.vmem %s2868_s20, 1024  ;;  %p1846_p10 = scmp.lt.s32.totalorder %s2868_s20, %s1844_s29 }
  0x43   : > { %v2144_v19 = vld [vmem:[%s2093_s11 + $0x28] sm:$0xff]  ;;  %v2173_v30 = vld [vmem:[%s2093_s11 + $0x30] sm:$0xff]  ;;  %1609 = vmatpush1.bf16.msra.mxu0 %v1608_v21  ;;  %1571 = vmatprep.subr.bf16.mxu1 %v1570_v31  ;;  %v555_v40 = vld [vmem:[%s2923_s3 + $0x38] sm:$0xff]  ;;  %s2874_s11 = scalar_lea.hbm %s2930_s10, %s1569_s21  ;;  %p1840_p6 = scmp.ne.s32.totalorder %s2868_s20, %s1839_s30 }
  0x44   : > { %v530_v36 = vld [vmem:[%s2922_s2 + $0x70] sm:$0xff]  ;;  %1611 = vmatprep.subr.bf16.mxu0 %v1610_v23  ;;  %v553_v39 = vld [vmem:[%s2923_s3 + $0x28] sm:$0xff]  ;;  %v552_v41 = vld [vmem:[%s2923_s3 + $0x20] sm:$0xff]  ;;  %1573 = vmatpush1.bf16.msra.mxu1 %v1572_v37 }
  0x45   : > { %v533_v42 = vld [vmem:[%s2922_s2 + $0x88] sm:$0xff]  ;;  %v535_v43 = vld [vmem:[%s2922_s2 + $0x98] sm:$0xff]  ;;  %v1574_v44 = vpack.c.bf16 %v555_v40, %v553_v39  ;;  %v554_v45 = vld [vmem:[%s2923_s3 + $0x30] sm:$0xff]  ;;  %v1616_v47 = vpack.c.bf16 %v530_v36, %v528_v35  ;;  %p1841_p13 = pnand %p1840_p6, %p2942_p12 }
  0x46   : > { %430 = vperm.xlu1 %1790, %v2104_v3   ;;  %424 = vperm.xlu0 %1789, %v2107_v4   ;;  %v557_v46 = vld [vmem:[%s2923_s3 + $0x48] sm:$0xff]  ;;  %v532_v48 = vld [vmem:[%s2922_s2 + $0x80] sm:$0xff]  ;;  %v534_v49 = vld [vmem:[%s2922_s2 + $0x90] sm:$0xff]  ;;  %v1576_v50 = vpack.c.bf16 %v554_v45, %v552_v41  ;;  %v1618_v52 = vpack.c.bf16 %v535_v43, %v533_v42 }
  0x47   : > { %1613 = vmatpush1.bf16.msra.mxu0 %v1612_v34  ;;  %1575 = vmatprep.subr.bf16.mxu1 %v1574_v44  ;;  %v559_v51 = vld [vmem:[%s2923_s3 + $0x58] sm:$0xff]  ;;  %v537_v53 = vld [vmem:[%s2922_s2 + $0xa8] sm:$0xff]  ;;  %v556_v55 = vld [vmem:[%s2923_s3 + $0x40] sm:$0xff]  ;;  %v1620_v61 = vpack.c.bf16 %v534_v49, %v532_v48  ;;  %p1842_p8 = pneg %p1841_p13 }
  0x48   : > { %1615 = vmatprep.subr.bf16.mxu0 %v1614_v38  ;;  %v1578_v54 = vpack.c.bf16 %v559_v51, %v557_v46  ;;  %v558_v56 = vld [vmem:[%s2923_s3 + $0x50] sm:$0xff]  ;;  %v539_v58 = vld [vmem:[%s2922_s2 + $0xb8] sm:$0xff]  ;;  %v561_v59 = vld [vmem:[%s2923_s3 + $0x68] sm:$0xff]  ;;  %1577 = vmatpush1.bf16.msra.mxu1 %v1576_v50 }
  0x49   : > { %v563_v60 = vld [vmem:[%s2923_s3 + $0x78] sm:$0xff]  ;;  %v536_v62 = vld [vmem:[%s2922_s2 + $0xa0] sm:$0xff]  ;;  %v538_v63 = vld [vmem:[%s2922_s2 + $0xb0] sm:$0xff]  ;;  %v1580_v0 = vpack.c.bf16 %v558_v56, %v556_v55  ;;  %v1622_v5 = vpack.c.bf16 %v539_v58, %v537_v53 }
  0x4a   : > { %436 = vperm.xlu1 %1790, %v2144_v19   ;;  %433 = vperm.xlu0 %1789, %v2147_v20   ;;  %v560_v7 = vld [vmem:[%s2923_s3 + $0x60] sm:$0xff]  ;;  %v562_v8 = vld [vmem:[%s2923_s3 + $0x70] sm:$0xff]  ;;  %v543_v9 = vld [vmem:[%s2922_s2 + $0xd8] sm:$0xff]  ;;  %v1624_v12 = vpack.c.bf16 %v538_v63, %v536_v62 }
  0x4b   : > { %1617 = vmatpush1.bf16.msra.mxu0 %v1616_v47  ;;  %1579 = vmatprep.subr.bf16.mxu1 %v1578_v54  ;;  %v565_v10 = vld [vmem:[%s2923_s3 + $0x88] sm:$0xff]  ;;  %v567_v11 = vld [vmem:[%s2923_s3 + $0x98] sm:$0xff]  ;;  %v540_v13 = vld [vmem:[%s2922_s2 + $0xc0] sm:$0xff]  ;;  %v1584_v15 = vpack.c.bf16 %v562_v8, %v560_v7  ;;  %v418_v47 = vlaneseq }
  0x4c   : > { %1619 = vmatprep.subr.bf16.mxu0 %v1618_v52  ;;  %v542_v14 = vld [vmem:[%s2922_s2 + $0xd0] sm:$0xff]  ;;  %1581 = vmatpush1.bf16.msra.mxu1 %v1580_v0  ;;  %v564_v17 = vld [vmem:[%s2923_s3 + $0x80] sm:$0xff]  ;;  %v547_v21 = vld [vmem:[%s2922_s2 + $0xf8] sm:$0xff] }
  0x4d   : > { %v566_v18 = vld [vmem:[%s2923_s3 + $0x90] sm:$0xff]  ;;  %v569_v23 = vld [vmem:[%s2923_s3 + $0xa8] sm:$0xff]  ;;  %v571_v24 = vld [vmem:[%s2923_s3 + $0xb8] sm:$0xff]  ;;  %v1628_v25 = vpack.c.bf16 %v542_v14, %v540_v13  ;;  %v2342_v50 = vand.u32 127, %v418_v47 }
  0x4e   : > { %442 = vperm.xlu1 %1790, %v2150_v22   ;;  %439 = vperm.xlu0 %1789, %v2173_v30   ;;  %v544_v26 = vld [vmem:[%s2922_s2 + $0xe0] sm:$0xff]  ;;  %v546_v27 = vld [vmem:[%s2922_s2 + $0xf0] sm:$0xff]  ;;  %v1588_v28 = vpack.c.bf16 %v566_v18, %v564_v17  ;;  %v809_v33 = vld [vmem:[%s2924_s4 + $0x18] sm:$0xff] }
  0x4f   : > { %1621 = vmatpush1.bf16.msra.mxu0 %v1620_v61  ;;  %v568_v31 = vld [vmem:[%s2923_s3 + $0xa0] sm:$0xff]  ;;  %v570_v32 = vld [vmem:[%s2923_s3 + $0xb0] sm:$0xff]  ;;  %v573_v34 = vld [vmem:[%s2923_s3 + $0xc8] sm:$0xff]  ;;  %v1632_v36 = vpack.c.bf16 %v546_v27, %v544_v26  ;;  %v1913_v61 = vmov 1.0  }
  0x50   : > { %1623 = vmatprep.subr.bf16.mxu0 %v1622_v5  ;;  %v575_v35 = vld [vmem:[%s2923_s3 + $0xd8] sm:$0xff]  ;;  %v1592_v37 = vpack.c.bf16 %v570_v32, %v568_v31  ;;  %v572_v40 = vld [vmem:[%s2923_s3 + $0xc0] sm:$0xff]  ;;  %v574_v41 = vld [vmem:[%s2923_s3 + $0xd0] sm:$0xff] }
  0x51   : > { %v1594_v39 = vpack.c.bf16 %v575_v35, %v573_v34  ;;  %v1596_v42 = vpack.c.bf16 %v574_v41, %v572_v40  ;;  %v576_v44 = vld [vmem:[%s2923_s3 + $0xe0] sm:$0xff]  ;;  %v578_v45 = vld [vmem:[%s2923_s3 + $0xf0] sm:$0xff]  ;;  %v811_v51 = vld [vmem:[%s2924_s4 + $0x28] sm:$0xff] }
  0x52   : > { %1791 = vset.pattern.permute.xlu0 %v1912_v57  ;;  %1792 = vset.pattern.permute.xlu1 %v1912_v57  ;;  %v1600_v46 = vpack.c.bf16 %v578_v45, %v576_v44  ;;  %v806_v48 = vld [vmem:[%s2924_s4] sm:$0xff]  ;;  %v808_v49 = vld [vmem:[%s2924_s4 + $0x10] sm:$0xff]  ;;  %v813_v52 = vld [vmem:[%s2924_s4 + $0x38] sm:$0xff] }
  0x53   : > { %469 = vperm.xlu0 %1791, %v2099_v2   ;;  %472 = vperm.xlu1 %1792, %v2107_v4   ;;  %v541_v2 = vld [vmem:[%s2922_s2 + $0xc8] sm:$0xff]  ;;  %v1582_v4 = vpack.c.bf16 %v563_v60, %v561_v59  ;;  %v1636_v53 = vpack.c.bf16 %v808_v49, %v806_v48  ;;  %v1638_v56 = vpack.c.bf16 %v813_v52, %v811_v51  ;;  %v810_v57 = vld [vmem:[%s2924_s4 + $0x20] sm:$0xff]  ;;  %v812_v58 = vld [vmem:[%s2924_s4 + $0x30] sm:$0xff] }
  0x54   : > { %v1626_v16 = vpack.c.bf16 %v543_v9, %v541_v2  ;;  %1625 = vmatpush1.bf16.msra.mxu0 %v1624_v12  ;;  %v815_v59 = vld [vmem:[%s2924_s4 + $0x48] sm:$0xff]  ;;  %v817_v60 = vld [vmem:[%s2924_s4 + $0x58] sm:$0xff]  ;;  %v1640_v62 = vpack.c.bf16 %v812_v58, %v810_v57  ;;  %v814_v2 = vld [vmem:[%s2924_s4 + $0x40] sm:$0xff] }
  0x55   : > { %1583 = vmatprep.subr.bf16.mxu1 %v1582_v4  ;;  %v1642_v5 = vpack.c.bf16 %v817_v60, %v815_v59  ;;  %v816_v4 = vld [vmem:[%s2924_s4 + $0x50] sm:$0xff]  ;;  %v819_v7 = vld [vmem:[%s2924_s4 + $0x68] sm:$0xff]  ;;  %v821_v8 = vld [vmem:[%s2924_s4 + $0x78] sm:$0xff]  ;;  %v1914_v60 = vmov 0.0|0.0  }
  0x56   : > { %1585 = vmatpush1.bf16.msra.mxu1 %v1584_v15  ;;  %1627 = vmatprep.subr.bf16.mxu0 %v1626_v16  ;;  %v1644_v9 = vpack.c.bf16 %v816_v4, %v814_v2  ;;  %v1646_v12 = vpack.c.bf16 %v821_v8, %v819_v7  ;;  %v818_v13 = vld [vmem:[%s2924_s4 + $0x60] sm:$0xff]  ;;  %v820_v14 = vld [vmem:[%s2924_s4 + $0x70] sm:$0xff]  ;;  %v823_v15 = vld [vmem:[%s2924_s4 + $0x88] sm:$0xff] }
  0x57   : > { %478 = vperm.xlu0 %1791, %v2104_v3   ;;  %475 = vperm.xlu1 %1792, %v2096_v1   ;;  %v545_v3 = vld [vmem:[%s2922_s2 + $0xe8] sm:$0xff]  ;;  %v1586_v1 = vpack.c.bf16 %v567_v11, %v565_v10  ;;  %v825_v16 = vld [vmem:[%s2924_s4 + $0x98] sm:$0xff]  ;;  %v822_v18 = vld [vmem:[%s2924_s4 + $0x80] sm:$0xff] }
  0x58   : > { %v1630_v29 = vpack.c.bf16 %v547_v21, %v545_v3  ;;  %1629 = vmatpush1.bf16.msra.mxu0 %v1628_v25  ;;  %v1648_v3 = vpack.c.bf16 %v820_v14, %v818_v13  ;;  %v1650_v17 = vpack.c.bf16 %v825_v16, %v823_v15  ;;  %v824_v21 = vld [vmem:[%s2924_s4 + $0x90] sm:$0xff]  ;;  %v829_v25 = vld [vmem:[%s2924_s4 + $0xb8] sm:$0xff]  ;;  %v831_v31 = vld [vmem:[%s2924_s4 + $0xc8] sm:$0xff]  ;;  %v970_v15 = vshrl.u32 %v418_v47, 7 }
  0x59   : > { %1587 = vmatprep.subr.bf16.mxu1 %v1586_v1  ;;  %v1652_v26 = vpack.c.bf16 %v824_v21, %v822_v18  ;;  %v833_v32 = vld [vmem:[%s2924_s4 + $0xd8] sm:$0xff]  ;;  %v830_v35 = vld [vmem:[%s2924_s4 + $0xc0] sm:$0xff]  ;;  %v2480_v51 = vld [vmem:[%s2083_s23 + $0x10] sm:$0xff] }
  0x5a   : > { %1589 = vmatpush1.bf16.msra.mxu1 %v1588_v28  ;;  %1631 = vmatprep.subr.bf16.mxu0 %v1630_v29  ;;  %v826_v28 = vld [vmem:[%s2924_s4 + $0xa0] sm:$0xff]  ;;  %v828_v29 = vld [vmem:[%s2924_s4 + $0xb0] sm:$0xff]  ;;  %v1658_v34 = vpack.c.bf16 %v833_v32, %v831_v31  ;;  %v998_v58 = vld [vmem:[%s2928_s8 + $0x8] sm:$0xff]  ;;  %v2556_v18 = vsub.s32 1, %v970_v15 }
  0x5b   : > { %484 = vperm.xlu0 %1791, %v2144_v19   ;;  %481 = vperm.xlu1 %1792, %v2147_v20   ;;  %v807_v19 = vld [vmem:[%s2924_s4 + $0x8] sm:$0xff]  ;;  %v1590_v20 = vpack.c.bf16 %v571_v24, %v569_v23  ;;  %v2463_v45 = vld [vmem:[%s2083_s23] sm:$0xff]  ;;  %v999_v59 = vld [vmem:[%s2928_s8 + $0x10] sm:$0xff] }
  0x5c   : > { %v1634_v38 = vpack.c.bf16 %v809_v33, %v807_v19  ;;  %1633 = vmatpush1.bf16.msra.mxu0 %v1632_v36  ;;  %v827_v24 = vld [vmem:[%s2924_s4 + $0xa8] sm:$0xff]  ;;  %v1656_v33 = vpack.c.bf16 %v828_v29, %v826_v28  ;;  %v832_v36 = vld [vmem:[%s2924_s4 + $0xd0] sm:$0xff]  ;;  %v997_v57 = vld [vmem:[%s2928_s8] sm:$0xff] }
  0x5d   : > { %1591 = vmatprep.subr.bf16.mxu1 %v1590_v20  ;;  %v1654_v27 = vpack.c.bf16 %v829_v25, %v827_v24  ;;  %v1660_v40 = vpack.c.bf16 %v832_v36, %v830_v35  ;;  %v1003_v2 = vld [vmem:[%s2928_s8 + $0x30] sm:$0xff]  ;;  %v1004_v4 = vld [vmem:[%s2928_s8 + $0x38] sm:$0xff]  ;;  %v1005_v8 = vld [vmem:[%s2928_s8 + $0x40] sm:$0xff] }
  0x5e   : > { %1593 = vmatpush1.bf16.msra.mxu1 %v1592_v37  ;;  %1635 = vmatprep.subr.bf16.mxu0 %v1634_v38  ;;  %v835_v38 = vld [vmem:[%s2924_s4 + $0xe8] sm:$0xff]  ;;  %v1676_v7 = vpack.c.bf16 %v1004_v4, %v1003_v2 }
  0x5f   : > { %490 = vperm.xlu0 %1791, %v2150_v22   ;;  %487 = vperm.xlu1 %1792, %v2173_v30   ;;  %v577_v22 = vld [vmem:[%s2923_s3 + $0xe8] sm:$0xff]  ;;  %v579_v30 = vld [vmem:[%s2923_s3 + $0xf8] sm:$0xff] }
  0x60   : > { %1595 = vmatprep.subr.bf16.mxu1 %v1594_v39  ;;  %v1598_v43 = vpack.c.bf16 %v579_v30, %v577_v22  ;;  %v837_v39 = vld [vmem:[%s2924_s4 + $0xf8] sm:$0xff]  ;;  %v834_v22 = vld [vmem:[%s2924_s4 + $0xe0] sm:$0xff]  ;;  %v836_v30 = vld [vmem:[%s2924_s4 + $0xf0] sm:$0xff] }
  0x61   : > { %v1662_v41 = vpack.c.bf16 %v837_v39, %v835_v38 }
  0x62   : > { %1597 = vmatpush1.bf16.msra.mxu1 %v1596_v42 }
  0x63   : > { %1599 = vmatprep.subr.bf16.mxu1 %v1598_v43  ;;  %v1664_v43 = vpack.c.bf16 %v836_v30, %v834_v22 }
  0x66   : > { %1601 = vmatpush1.bf16.msra.mxu1 %v1600_v46  ;;  %v2472_v46 = vld [vmem:[%s2083_s23 + $0x8] sm:$0xff] }
  0x67   : > { %1666 = vmatprep.subr.bf16.mxu1 %v1914_v60 }
  0xc1   : > { %v428_v54 = vpop.permute.xlu1 %427  ;;  %v422_v55 = vpop.permute.xlu0 %421 }
  0xc2   : > { %vm444_vm0 = vcmp.eq.s32.totalorder %v2342_v50, %v422_v55  ;;  %vm446_vm2 = vcmp.eq.s32.totalorder %v2342_v50, %v428_v54  ;;  %v2496_v54 = vld [vmem:[%s2083_s23 + $0x20] sm:$0xff]  ;;  %v2501_v55 = vld [vmem:[%s2083_s23 + $0x28] sm:$0xff] }
  0xc3   : > { %1546 = vmatmul.mubr.msk.f32.vlgmr.msra.gmra.mrb[0].mxu0 %vm444_vm0, %v1913_v61  ;;  %vm1022_vm0 = vcmask 523264  }
  0xc4   : > { %1637 = vmatpush1.bf16.msra.mxu0 %v1636_v53  ;;  %763 = vmatprep.mubr.f32.mxu0 %v1911_v6  ;;  %v2488_v53 = vld [vmem:[%s2083_s23 + $0x18] sm:$0xff] }
  0xc5   : > { %v431_v63 = vpop.permute.xlu1 %430  ;;  %v425_v0 = vpop.permute.xlu0 %424  ;;  %1639 = vmatprep.subr.bf16.mxu0 %v1638_v56  ;;  %v2506_v56 = vld [vmem:[%s2083_s23 + $0x30] sm:$0xff] }
  0xc6   : > { %vm445_vm1 = vcmp.eq.s32.totalorder %v2342_v50, %v425_v0  ;;  %vm447_vm3 = vcmp.eq.s32.totalorder %v2342_v50, %v431_v63  ;;  %v1001_v63 = vld [vmem:[%s2928_s8 + $0x20] sm:$0xff]  ;;  %v1002_v0 = vld [vmem:[%s2928_s8 + $0x28] sm:$0xff] }
  0xc7   : > { %1547 = vmatmul.mubr.msk.f32.gmra.mrb[2].mxu0 %vm445_vm1, %v1913_v61 }
  0xc8   : > { %1641 = vmatpush1.bf16.msra.mxu0 %v1640_v62  ;;  %769 = vmatprep.mubr.f32.mxu0 %v1911_v6 }
  0xc9   : > { %v437_v10 = vpop.permute.xlu1 %436  ;;  %v434_v11 = vpop.permute.xlu0 %433  ;;  %1643 = vmatprep.subr.bf16.mxu0 %v1642_v5  ;;  %v1673_v5 = vpack.c.bf16 %v1002_v0, %v1001_v63 }
  0xca   : > { %vm448_vm4 = vcmp.eq.s32.totalorder %v2342_v50, %v434_v11  ;;  %vm449_vm7 = vcmp.eq.s32.totalorder %v2342_v50, %v437_v10 }
  0xcb   : > { %1548 = vmatmul.mubr.msk.f32.gmra.mrb[4].mxu0 %vm446_vm2, %v1913_v61 }
  0xcc   : > { %1645 = vmatpush1.bf16.msra.mxu0 %v1644_v9  ;;  %775 = vmatprep.mubr.f32.mxu0 %v1911_v6  ;;  %v1006_v9 = vld [vmem:[%s2928_s8 + $0x48] sm:$0xff] }
  0xcd   : > { %v440_v1 = vpop.permute.xlu0 %439  ;;  %1647 = vmatprep.subr.bf16.mxu0 %v1646_v12  ;;  %v443_v23 = vpop.permute.xlu1 %442  ;;  %v1679_v10 = vpack.c.bf16 %v1006_v9, %v1005_v8 }
  0xce   : > { %vm450_vm9 = vcmp.eq.s32.totalorder %v2342_v50, %v440_v1  ;;  %vm451_vm11 = vcmp.eq.s32.totalorder %v2342_v50, %v443_v23  ;;  %v2551_v1 = vsub.s32 0, %v970_v15 }
  0xcf   : > { %1549 = vmatmul.mubr.msk.f32.gmra.mrb[6].mxu0 %vm447_vm3, %v1913_v61 }
  0xd0   : > { %1649 = vmatpush1.bf16.msra.mxu0 %v1648_v3  ;;  %781 = vmatprep.mubr.f32.mxu0 %v1911_v6 }
  0xd1   : > { %1651 = vmatprep.subr.bf16.mxu0 %v1650_v17  ;;  %v967_v17 = vld [vmem:[%s2925_s5] sm:$0x3] }
  0xd2   : > { %v470_v19 = vpop.permute.xlu0 %469  ;;  %v473_v20 = vpop.permute.xlu1 %472  ;;  %v2559_v24 = vrot.slane %v967_v17, %v2551_v1 }
  0xd3   : > { %vm492_vm5 = vcmp.eq.s32.totalorder %v2342_v50, %v470_v19  ;;  %1550 = vmatmul.mubr.msk.f32.gmra.mrb[8].mxu0 %vm448_vm4, %v1913_v61  ;;  %vm493_vm6 = vcmp.eq.s32.totalorder %v2342_v50, %v473_v20 }
  0xd4   : > { %1653 = vmatpush1.bf16.msra.mxu0 %v1652_v26  ;;  %1538 = vmatmul.mubr.msk.f32.vlgmr.msra.gmra.mrb[0].mxu1 %vm492_vm5, %v1913_v61  ;;  %v2562_v26 = vrot.slane %v967_v17, %v2556_v18 }
  0xd5   : > { %787 = vmatprep.mubr.f32.mxu0 %v1911_v6  ;;  %1655 = vmatprep.subr.bf16.mxu0 %v1654_v27 }
  0xd6   : > { %650 = vmatprep.mubr.f32.mxu1 %v1911_v6  ;;  %v476_v37 = vpop.permute.xlu1 %475  ;;  %v479_v42 = vpop.permute.xlu0 %478 }
  0xd7   : > { %1551 = vmatmul.mubr.msk.f32.gmra.mrb[10].mxu0 %vm449_vm7, %v1913_v61  ;;  %vm494_vm8 = vcmp.eq.s32.totalorder %v2342_v50, %v476_v37  ;;  %vm495_vm10 = vcmp.eq.s32.totalorder %v2342_v50, %v479_v42 }
  0xd8   : > { %1657 = vmatpush1.bf16.msra.mxu0 %v1656_v33  ;;  %1539 = vmatmul.mubr.msk.f32.gmra.mrb[2].mxu1 %vm493_vm6, %v1913_v61 }
  0xd9   : > { %793 = vmatprep.mubr.f32.mxu0 %v1911_v6  ;;  %1659 = vmatprep.subr.bf16.mxu0 %v1658_v34 }
  0xda   : > { %656 = vmatprep.mubr.f32.mxu1 %v1911_v6  ;;  %v482_v44 = vpop.permute.xlu1 %481  ;;  %v485_v48 = vpop.permute.xlu0 %484 }
  0xdb   : > { %1552 = vmatmul.mubr.msk.f32.gmra.mrb[12].mxu0 %vm450_vm9, %v1913_v61  ;;  %vm496_vm12 = vcmp.eq.s32.totalorder %v2342_v50, %v482_v44  ;;  %vm497_vm13 = vcmp.eq.s32.totalorder %v2342_v50, %v485_v48 }
  0xdc   : > { %1661 = vmatpush1.bf16.msra.mxu0 %v1660_v40  ;;  %1540 = vmatmul.mubr.msk.f32.gmra.mrb[4].mxu1 %vm494_vm8, %v1913_v61 }
  0xdd   : > { %799 = vmatprep.mubr.f32.mxu0 %v1911_v6  ;;  %1663 = vmatprep.subr.bf16.mxu0 %v1662_v41 }
  0xde   : > { %662 = vmatprep.mubr.f32.mxu1 %v1911_v6  ;;  %v488_v49 = vpop.permute.xlu1 %487  ;;  %v491_v52 = vpop.permute.xlu0 %490 }
  0xdf   : > { %1553 = vmatmul.mubr.msk.f32.gmra.mrb[14].mxu0 %vm451_vm11, %v1913_v61  ;;  %vm498_vm14 = vcmp.eq.s32.totalorder %v2342_v50, %v488_v49  ;;  %vm499_vm15 = vcmp.eq.s32.totalorder %v2342_v50, %v491_v52  ;;  %v2511_v50 = vld [vmem:[%s2083_s23 + $0x38] sm:$0xff]  ;;  %s1845_s23 = scalar_lea.vmem %s1844_s29, 2048 }
  0xe0   : > { %1665 = vmatpush1.bf16.msra.mxu0 %v1664_v43  ;;  %1541 = vmatmul.mubr.msk.f32.gmra.mrb[6].mxu1 %vm495_vm10, %v1913_v61  ;;  %p1847_p0 = scmp.lt.s32.totalorder %s1845_s23, %s1839_s30 }
  0xe1   : > { %902 = vmatprep.mubr.f32.mxu0 %v1911_v6  ;;  %668 = vmatprep.mubr.f32.mxu1 %v1911_v6 }
  0xe2   : > { %p1848_p2 = por %p1847_p0, %p1846_p10 }
  0xe3   : > { %903 = vmatmul.mubr.f32.vlgmr.msra.gmra.mrb[0].mxu0 %v2463_v45 }
  0xe4   : > { %1542 = vmatmul.mubr.msk.f32.gmra.mrb[8].mxu1 %vm496_vm12, %v1913_v61  ;;  %908 = vmatprep.mubr.f32.mxu0 %v1911_v6  ;;  %p1849_p4 = pnand %p1848_p2, %p1842_p8 }
  0xe5   : > { %674 = vmatprep.mubr.f32.mxu1 %v1911_v6 }
  0xe7   : > { %909 = vmatmul.mubr.f32.gmra.mrb[2].mxu0 %v2472_v46 }
  0xe8   : > { %1543 = vmatmul.mubr.msk.f32.gmra.mrb[10].mxu1 %vm497_vm13, %v1913_v61  ;;  %914 = vmatprep.mubr.f32.mxu0 %v1911_v6 }
  0xe9   : > { %680 = vmatprep.mubr.f32.mxu1 %v1911_v6 }
  0xeb   : > { %915 = vmatmul.mubr.f32.gmra.mrb[4].mxu0 %v2480_v51 }
  0xec   : > { %1544 = vmatmul.mubr.msk.f32.gmra.mrb[12].mxu1 %vm498_vm14, %v1913_v61  ;;  %920 = vmatprep.mubr.f32.mxu0 %v1911_v6 }
  0xed   : > { %686 = vmatprep.mubr.f32.mxu1 %v1911_v6 }
  0xef   : > { %921 = vmatmul.mubr.f32.gmra.mrb[6].mxu0 %v2488_v53 }
  0xf0   : > { %1545 = vmatmul.mubr.msk.f32.gmra.mrb[14].mxu1 %vm499_vm15, %v1913_v61  ;;  %926 = vmatprep.mubr.f32.mxu0 %v1911_v6  ;;  %v1000_v61 = vld [vmem:[%s2928_s8 + $0x18] sm:$0xff] }
  0xf1   : > { %v1670_v62 = vpack.c.bf16 %v1000_v61, %v999_v59 }
  0xf3   : > { %927 = vmatmul.mubr.f32.gmra.mrb[8].mxu0 %v2496_v54 }
  0xf4   : > { %932 = vmatprep.mubr.f32.mxu0 %v1911_v6 }
  0xf7   : > { %933 = vmatmul.mubr.f32.gmra.mrb[10].mxu0 %v2501_v55 }
  0xf8   : > { %938 = vmatprep.mubr.f32.mxu0 %v1911_v6 }
  0xfb   : > { %939 = vmatmul.mubr.f32.gmra.mrb[12].mxu0 %v2506_v56 }
  0xfc   : > { %944 = vmatprep.mubr.f32.mxu0 %v1911_v6  ;;  %v1667_v6 = vpack.c.bf16 %v998_v58, %v997_v57 }
  0xfe   : > { %1668 = vmatpush1.bf16.msra.mxu1 %v1667_v6 }
  0xff   : > { %945 = vmatmul.mubr.f32.gmra.mrb[14].mxu0 %v2511_v50  ;;  %1669 = vmatprep.subr.bf16.mxu1 %v1914_v60 }
 0x102   : > { %1671 = vmatpush1.bf16.msra.mxu1 %v1670_v62 }
 0x103   : > { %1672 = vmatprep.subr.bf16.mxu1 %v1914_v60 }
 0x106   : > { %1674 = vmatpush1.bf16.msra.mxu1 %v1673_v5 }
 0x107   : > { %1675 = vmatprep.subr.bf16.mxu1 %v1914_v60 }
 0x10a   : > { %1677 = vmatpush1.bf16.msra.mxu1 %v1676_v7 }
 0x10b   : > { %1678 = vmatprep.subr.bf16.mxu1 %v1914_v60 }
 0x10e   : > { %1680 = vmatpush1.bf16.msra.mxu1 %v1679_v10 }
 0x10f   : > { %1681 = vmatprep.subr.bf16.mxu1 %v1914_v60 }
 0x1a7   : > { %v646_v11 = vpop.f32.mrb[0].mxu1 }
 0x1a8   : > { %v648_v12 = vpop.f32.mrb[1].mxu1 }
 0x1ab   : > { %v652_v13 = vpop.f32.mrb[2].mxu1 }
 0x1ac   : > { %v654_v14 = vpop.f32.mrb[3].mxu1 }
 0x1af   : > { %v658_v16 = vpop.f32.mrb[4].mxu1 }
 0x1b0   : > { %v660_v3 = vpop.f32.mrb[5].mxu1 }
 0x1b3   : > { %v664_v21 = vpop.f32.mrb[6].mxu1 }
 0x1b4   : > { %v666_v23 = vpop.f32.mrb[7].mxu1 }
 0x1b6   : > { %v904_v25 = vpop.f32.mrb[0].mxu0 }
 0x1b7   : > { %v1702_v47 = vadd.f32 %v904_v25, %v646_v11  ;;  %v906_v27 = vpop.f32.mrb[1].mxu0  ;;  %v670_v28 = vpop.f32.mrb[8].mxu1 }
 0x1b8   : > { %v1703_v29 = vadd.f32 %v906_v27, %v648_v12  ;;  %v672_v19 = vpop.f32.mrb[9].mxu1 }
 0x1b9   : > { %v2565_v20 = vadd.f32 %v1702_v47, %v2559_v24 }
 0x1ba   : > { %v2568_v31 = vadd.f32 %v1703_v29, %v2562_v26  ;;  %v910_v32 = vpop.f32.mrb[2].mxu0 }
 0x1bb   : > { %v1704_v33 = vadd.f32 %v910_v32, %v652_v13  ;;  %v676_v34 = vpop.f32.mrb[10].mxu1  ;;  %v912_v35 = vpop.f32.mrb[3].mxu0  ;;  %v1063_v22 = vmul.f32 %v2565_v20, %v2565_v20 }
 0x1bc   : > { %v1705_v36 = vadd.f32 %v912_v35, %v654_v14  ;;  %v678_v37 = vpop.f32.mrb[11].mxu1  ;;  %v1023_v38 = vsel %vm1022_vm0, %v2568_v31, 0.0  ;;  %v1064_v39 = vmul.f32 %v2568_v31, %v2568_v31 }
 0x1bd   : > { %v2575_v40 = vadd.f32 %v1704_v33, %v2559_v24  ;;  %v1024_v41 = vadd.f32 %v1023_v38, %v2565_v20 }
 0x1be   : > { %v2581_v30 = vadd.f32 %v1705_v36, %v2562_v26  ;;  %v916_v42 = vpop.f32.mrb[4].mxu0  ;;  %v1079_v43 = vsel %vm1022_vm0, %v1064_v39, 0.0 }
 0x1bf   : > { %v1706_v44 = vadd.f32 %v916_v42, %v658_v16  ;;  %v682_v48 = vpop.f32.mrb[12].mxu1  ;;  %1025 = vadd.xlane.f32.xlu1 %v1024_v41  ;;  %v918_v49 = vpop.f32.mrb[5].mxu0  ;;  %v1080_v52 = vadd.f32 %v1079_v43, %v1063_v22  ;;  %v1065_v62 = vmul.f32 %v2575_v40, %v2575_v40 }
 0x1c0   : > { %v1707_v57 = vadd.f32 %v918_v49, %v660_v3  ;;  %v684_v58 = vpop.f32.mrb[13].mxu1  ;;  %v1066_v59 = vmul.f32 %v2581_v30, %v2581_v30  ;;  %v1027_v6 = vsel %vm1022_vm0, %v2581_v30, 0.0 }
 0x1c1   : > { %v2589_v61 = vadd.f32 %v1706_v44, %v2559_v24  ;;  %1081 = vadd.xlane.f32.xlu0 %v1080_v52  ;;  %v1028_v9 = vadd.f32 %v1027_v6, %v2575_v40 }
 0x1c2   : > { %v2594_v63 = vadd.f32 %v1707_v57, %v2562_v26  ;;  %v922_v0 = vpop.f32.mrb[6].mxu0  ;;  %v1083_v5 = vsel %vm1022_vm0, %v1066_v59, 0.0 }
 0x1c3   : > { %v1708_v2 = vadd.f32 %v922_v0, %v664_v21  ;;  %v2597_v4 = vpop.f32.mrb[14].mxu1  ;;  %v924_v7 = vpop.f32.mrb[7].mxu0  ;;  %v1084_v8 = vadd.f32 %v1083_v5, %v1065_v62  ;;  %v1067_v15 = vmul.f32 %v2589_v61, %v2589_v61 }
 0x1c4   : > { %v1709_v10 = vadd.f32 %v924_v7, %v666_v23  ;;  %v2600_v11 = vpop.f32.mrb[15].mxu1  ;;  %v1068_v12 = vmul.f32 %v2594_v63, %v2594_v63  ;;  %v1031_v13 = vsel %vm1022_vm0, %v2594_v63, 0.0 }
 0x1c5   : > { %v2607_v14 = vadd.f32 %v1708_v2, %v2559_v24  ;;  %1085 = vadd.xlane.f32.xlu1 %v1084_v8  ;;  %1029 = vadd.xlane.f32.xlu0 %v1028_v9  ;;  %v1032_v47 = vadd.f32 %v1031_v13, %v2589_v61  ;;  %v1009_v13 = vld [vmem:[%s2928_s8 + $0x60] sm:$0xff] }
 0x1c6   : > { %v2612_v16 = vadd.f32 %v1709_v10, %v2562_v26  ;;  %v928_v3 = vpop.f32.mrb[8].mxu0  ;;  %v1087_v17 = vsel %vm1022_vm0, %v1068_v12, 0.0 }
 0x1c7   : > { %v1710_v21 = vadd.f32 %v928_v3, %v670_v28  ;;  %v930_v23 = vpop.f32.mrb[9].mxu0  ;;  %v1088_v25 = vadd.f32 %v1087_v17, %v1067_v15  ;;  %v1069_v35 = vmul.f32 %v2607_v14, %v2607_v14 }
 0x1c8   : > { %v1711_v27 = vadd.f32 %v930_v23, %v672_v19  ;;  %v1070_v29 = vmul.f32 %v2612_v16, %v2612_v16  ;;  %v1035_v32 = vsel %vm1022_vm0, %v2612_v16, 0.0 }
 0x1c9   : > { %v2621_v33 = vadd.f32 %v1710_v21, %v2559_v24  ;;  %1089 = vadd.xlane.f32.xlu1 %v1088_v25  ;;  %1033 = vadd.xlane.f32.xlu0 %v1032_v47  ;;  %v1036_v22 = vadd.f32 %v1035_v32, %v2607_v14 }
 0x1ca   : > { %v2626_v28 = vadd.f32 %v1711_v27, %v2562_v26  ;;  %v934_v36 = vpop.f32.mrb[10].mxu0  ;;  %v1091_v19 = vsel %vm1022_vm0, %v1070_v29, 0.0 }
 0x1cb   : > { %v1712_v38 = vadd.f32 %v934_v36, %v676_v34  ;;  %v936_v39 = vpop.f32.mrb[11].mxu0  ;;  %v1092_v41 = vadd.f32 %v1091_v19, %v1069_v35  ;;  %v1071_v52 = vmul.f32 %v2621_v33, %v2621_v33  ;;  %v1007_v34 = vld [vmem:[%s2928_s8 + $0x50] sm:$0xff] }
 0x1cc   : > { %v1713_v42 = vadd.f32 %v936_v39, %v678_v37  ;;  %v1072_v43 = vmul.f32 %v2626_v28, %v2626_v28  ;;  %v1039_v44 = vsel %vm1022_vm0, %v2626_v28, 0.0  ;;  %v1008_v37 = vld [vmem:[%s2928_s8 + $0x58] sm:$0xff]  ;;  %v1011_v19 = vld [vmem:[%s2928_s8 + $0x70] sm:$0xff] }
 0x1cd   : > { %v2635_v49 = vadd.f32 %v1712_v38, %v2559_v24  ;;  %1093 = vadd.xlane.f32.xlu1 %v1092_v41  ;;  %1037 = vadd.xlane.f32.xlu0 %v1036_v22  ;;  %v1682_v62 = vpack.c.bf16 %v1008_v37, %v1007_v34  ;;  %v1040_v7 = vadd.f32 %v1039_v44, %v2621_v33  ;;  %v1014_v34 = vld [vmem:[%s2928_s8 + $0x88] sm:$0xff] }
 0x1ce   : > { %v2646_v57 = vadd.f32 %v1713_v42, %v2562_v26  ;;  %v940_v59 = vpop.f32.mrb[12].mxu0  ;;  %v1095_v6 = vsel %vm1022_vm0, %v1072_v43, 0.0 }
 0x1cf   : > { %v1714_v0 = vadd.f32 %v940_v59, %v682_v48  ;;  %v942_v5 = vpop.f32.mrb[13].mxu0  ;;  %v1096_v2 = vadd.f32 %v1095_v6, %v1071_v52  ;;  %1683 = vmatpush1.bf16.msra.mxu1 %v1682_v62  ;;  %v1073_v48 = vmul.f32 %v2635_v49, %v2635_v49  ;;  %v1013_v52 = vld [vmem:[%s2928_s8 + $0x80] sm:$0xff]  ;;  %v1015_v62 = vld [vmem:[%s2928_s8 + $0x90] sm:$0xff] }
 0x1d0   : > { %v1715_v8 = vadd.f32 %v942_v5, %v684_v58  ;;  %v1074_v9 = vmul.f32 %v2646_v57, %v2646_v57  ;;  %v1043_v10 = vsel %vm1022_vm0, %v2646_v57, 0.0  ;;  %v1010_v58 = vld [vmem:[%s2928_s8 + $0x68] sm:$0xff]  ;;  %1684 = vmatprep.subr.bf16.mxu1 %v1914_v60  ;;  %v1691_v6 = vpack.c.bf16 %v1014_v34, %v1013_v52  ;;  %v995_v34 = vld [vmem:[%s2926_s6] sm:$0x3] }
 0x1d1   : > { %v2655_v12 = vadd.f32 %v1714_v0, %v2559_v24  ;;  %1097 = vadd.xlane.f32.xlu1 %v1096_v2  ;;  %1041 = vadd.xlane.f32.xlu0 %v1040_v7  ;;  %v1685_v21 = vpack.c.bf16 %v1010_v58, %v1009_v13  ;;  %v1044_v27 = vadd.f32 %v1043_v10, %v2635_v49  ;;  %v1016_v0 = vld [vmem:[%s2928_s8 + $0x98] sm:$0xff]  ;;  %v1017_v2 = vld [vmem:[%s2928_s8 + $0xa0] sm:$0xff]  ;;  %v1018_v7 = vld [vmem:[%s2928_s8 + $0xa8] sm:$0xff] }
 0x1d2   : > { %v2666_v15 = vadd.f32 %v1715_v8, %v2562_v26  ;;  %v946_v3 = vpop.f32.mrb[14].mxu0  ;;  %v1099_v17 = vsel %vm1022_vm0, %v1074_v9, 0.0  ;;  %v1694_v5 = vpack.c.bf16 %v1016_v0, %v1015_v62  ;;  %v1697_v8 = vpack.c.bf16 %v1018_v7, %v1017_v2  ;;  %v1019_v9 = vld [vmem:[%s2928_s8 + $0xb0] sm:$0xff]  ;;  %v1020_v10 = vld [vmem:[%s2928_s8 + $0xb8] sm:$0xff] }
 0x1d3   : > { %v1716_v23 = vadd.f32 %v946_v3, %v2597_v4  ;;  %v948_v25 = vpop.f32.mrb[15].mxu0  ;;  %v1100_v47 = vadd.f32 %v1099_v17, %v1073_v48  ;;  %1686 = vmatpush1.bf16.msra.mxu1 %v1685_v21  ;;  %v1075_v4 = vmul.f32 %v2655_v12, %v2655_v12  ;;  %v1700_v48 = vpack.c.bf16 %v1020_v10, %v1019_v9 }
 0x1d4   : > { %v1717_v29 = vadd.f32 %v948_v25, %v2600_v11  ;;  %v1076_v32 = vmul.f32 %v2666_v15, %v2666_v15  ;;  %v1047_v35 = vsel %vm1022_vm0, %v2666_v15, 0.0  ;;  %v1012_v11 = vld [vmem:[%s2928_s8 + $0x78] sm:$0xff]  ;;  %1687 = vmatprep.subr.bf16.mxu1 %v1914_v60 }
 0x1d5   : > { %v2678_v36 = vadd.f32 %v1716_v23, %v2559_v24  ;;  %1101 = vadd.xlane.f32.xlu1 %v1100_v47  ;;  %1045 = vadd.xlane.f32.xlu0 %v1044_v27  ;;  %v1688_v24 = vpack.c.bf16 %v1012_v11, %v1011_v19  ;;  %v1048_v22 = vadd.f32 %v1047_v35, %v2655_v12 }
 0x1d6   : > { %v2689_v38 = vadd.f32 %v1717_v29, %v2562_v26  ;;  %v1103_v39 = vsel %vm1022_vm0, %v1076_v32, 0.0 }
 0x1d7   : > { %v1104_v41 = vadd.f32 %v1103_v39, %v1075_v4  ;;  %1689 = vmatpush1.bf16.msra.mxu1 %v1688_v24  ;;  %v1077_v26 = vmul.f32 %v2678_v36, %v2678_v36 }
 0x1d8   : > { %v1078_v42 = vmul.f32 %v2689_v38, %v2689_v38  ;;  %v1051_v43 = vsel %vm1022_vm0, %v2689_v38, 0.0  ;;  %1690 = vmatprep.subr.bf16.mxu1 %v1914_v60 }
 0x1d9   : > { %1105 = vadd.xlane.f32.xlu1 %v1104_v41  ;;  %1049 = vadd.xlane.f32.xlu0 %v1048_v22  ;;  %v1052_v59 = vadd.f32 %v1051_v43, %v2678_v36 }
 0x1da   : > { %v1107_v44 = vsel %vm1022_vm0, %v1078_v42, 0.0 }
 0x1db   : > { %v1108_v37 = vadd.f32 %v1107_v44, %v1077_v26  ;;  %1692 = vmatpush1.bf16.msra.mxu1 %v1691_v6 }
 0x1dc   : > { %1693 = vmatprep.subr.bf16.mxu1 %v1914_v60 }
 0x1dd   : > { %1109 = vadd.xlane.f32.xlu1 %v1108_v37  ;;  %1053 = vadd.xlane.f32.xlu0 %v1052_v59 }
 0x1df   : > { %1695 = vmatpush1.bf16.msra.mxu1 %v1694_v5 }
 0x1e0   : > { %1696 = vmatprep.subr.bf16.mxu1 %v1914_v60 }
 0x1e3   : > { %1698 = vmatpush1.bf16.msra.mxu1 %v1697_v8  ;;  %v996_v8 = vld [vmem:[%s2927_s7] sm:$0x3] }
 0x1e4   : > { %1699 = vmatprep.subr.bf16.mxu1 %v1914_v60 }
 0x1e7   : > { %1701 = vmatpush1.bf16.msra.mxu1 %v1700_v48  ;;  %v2753_v48 = vrot.slane %v995_v34, %v2551_v1 }
 0x24c   : > { %v1026_v13 = vpop.xlane.xlu1 %1025 }
 0x24d   : > { %v1055_v58 = vmul.f32 0.0052083335, %v1026_v13  ;;  %v2756_v13 = vrot.slane %v995_v34, %v2556_v18 }
 0x24e   : > { %v1082_v3 = vpop.xlane.xlu0 %1081 }
 0x24f   : > { %v1111_v17 = vmul.f32 0.0052083335, %v1082_v3  ;;  %v1119_v21 = vmul.f32 %v1055_v58, %v1055_v58  ;;  %v1143_v9 = vsub.f32 %v2565_v20, %v1055_v58  ;;  %v1144_v10 = vsub.f32 %v2568_v31, %v1055_v58 }
 0x250   : > { %v2761_v20 = vrot.slane %v996_v8, %v2551_v1  ;;  %v2764_v31 = vrot.slane %v996_v8, %v2556_v18 }
 0x251   : > { %v1127_v23 = vsub.f32 %v1111_v17, %v1119_v21 }
 0x252   : > { %v1086_v25 = vpop.xlane.xlu1 %1085  ;;  %v1030_v47 = vpop.xlane.xlu0 %1029 }
 0x253   : > { %v1135_v27 = vmax.f32 %v1127_v23, 0.0  ;;  %v2730_v29 = vmul.f32 0.0052083335, %v1030_v47  ;;  %v1112_v35 = vmul.f32 0.0052083335, %v1086_v25 }
 0x255   : > { %v1159_v32 = vadd.f32 1e-05, %v1135_v27  ;;  %v1120_v4 = vmul.f32 %v2730_v29, %v2730_v29  ;;  %v1145_v1 = vsub.f32 %v2575_v40, %v2730_v29  ;;  %v1146_v18 = vsub.f32 %v2581_v30, %v2730_v29 }
 0x256   : > { %v1090_v19 = vpop.xlane.xlu1 %1089  ;;  %v1034_v60 = vpop.xlane.xlu0 %1033 }
 0x257   : > { %1793 = vrsqrt.f32 %v1159_v32  ;;  %v1128_v11 = vsub.f32 %v1112_v35, %v1120_v4  ;;  %v2734_v39 = vmul.f32 0.0052083335, %v1034_v60  ;;  %v1113_v41 = vmul.f32 0.0052083335, %v1090_v19 }
 0x259   : > { %v1136_v24 = vmax.f32 %v1128_v11, 0.0  ;;  %v1121_v22 = vmul.f32 %v2734_v39, %v2734_v39  ;;  %v1147_v8 = vsub.f32 %v2589_v61, %v2734_v39 }
 0x25a   : > { %v1094_v42 = vpop.xlane.xlu1 %1093  ;;  %v1038_v43 = vpop.xlane.xlu0 %1037 }
 0x25b   : > { %v1160_v26 = vadd.f32 1e-05, %v1136_v24  ;;  %v1129_v44 = vsub.f32 %v1113_v41, %v1121_v22  ;;  %v2738_v52 = vmul.f32 0.0052083335, %v1038_v43  ;;  %v1114_v59 = vmul.f32 0.0052083335, %v1094_v42 }
 0x25d   : > { %1795 = vrsqrt.f32 %v1160_v26  ;;  %v1137_v37 = vmax.f32 %v1129_v44, 0.0  ;;  %v1122_v6 = vmul.f32 %v2738_v52, %v2738_v52 }
 0x25e   : > { %v1098_v62 = vpop.xlane.xlu1 %1097  ;;  %v1042_v0 = vpop.xlane.xlu0 %1041 }
 0x25f   : > { %v1161_v5 = vadd.f32 1e-05, %v1137_v37  ;;  %v1130_v2 = vsub.f32 %v1114_v59, %v1122_v6  ;;  %v2745_v7 = vmul.f32 0.0052083335, %v1042_v0  ;;  %v1115_v21 = vmul.f32 0.0052083335, %v1098_v62 }
 0x261   : > { %v1794_v3 = vpop.eup %1793  ;;  %1797 = vrsqrt.f32 %v1161_v5  ;;  %v1138_v17 = vmax.f32 %v1130_v2, 0.0  ;;  %v1123_v23 = vmul.f32 %v2745_v7, %v2745_v7 }
 0x262   : > { %v1175_v25 = vmul.f32 %v1794_v3, %v1143_v9  ;;  %v1102_v47 = vpop.xlane.xlu1 %1101  ;;  %v1046_v27 = vpop.xlane.xlu0 %1045  ;;  %v1176_v32 = vmul.f32 %v1794_v3, %v1144_v10  ;;  %v1148_v9 = vsub.f32 %v2594_v63, %v2734_v39 }
 0x263   : > { %v1162_v58 = vadd.f32 1e-05, %v1138_v17  ;;  %v1131_v35 = vsub.f32 %v1115_v21, %v1123_v23  ;;  %v2766_v4 = vmul.f32 0.0052083335, %v1046_v27  ;;  %v1116_v24 = vmul.f32 0.0052083335, %v1102_v47 }
 0x264   : > { %v1203_v19 = vmul.f32 %v2756_v13, %v1176_v32  ;;  %v1202_v60 = vmul.f32 %v2753_v48, %v1175_v25  ;;  %v1149_v23 = vsub.f32 %v2607_v14, %v2738_v52  ;;  %v1150_v14 = vsub.f32 %v2612_v16, %v2738_v52 }
 0x265   : > { %1799 = vrsqrt.f32 %v1162_v58  ;;  %v1139_v11 = vmax.f32 %v1131_v35, 0.0  ;;  %v1124_v41 = vmul.f32 %v2766_v4, %v2766_v4 }
 0x266   : > { %v1106_v22 = vpop.xlane.xlu1 %1105  ;;  %v1050_v42 = vpop.xlane.xlu0 %1049  ;;  %v1230_v43 = vadd.f32 %v2764_v31, %v1203_v19  ;;  %v1229_v26 = vadd.f32 %v2761_v20, %v1202_v60 }
 0x267   : > { %v1796_v44 = vpop.eup %1795  ;;  %v1163_v34 = vadd.f32 1e-05, %v1139_v11  ;;  %v1132_v37 = vsub.f32 %v1116_v24, %v1124_v41  ;;  %v2778_v59 = vmul.f32 0.0052083335, %v1050_v42  ;;  %v1117_v2 = vmul.f32 0.0052083335, %v1106_v22 }
 0x268   : > { %v1177_v6 = vmul.f32 %v1796_v44, %v1145_v1  ;;  %v1178_v62 = vmul.f32 %v1796_v44, %v1146_v18  ;;  %v1246_v0 = vmax.f32 %v1230_v43, 0.0  ;;  %v1245_v5 = vmax.f32 %v1229_v26, 0.0 }
 0x269   : > { %1801 = vrsqrt.f32 %v1163_v34  ;;  %v1140_v40 = vmax.f32 %v1132_v37, 0.0  ;;  %v1125_v30 = vmul.f32 %v2778_v59, %v2778_v59  ;;  %v1151_v44 = vsub.f32 %v2621_v33, %v2745_v7 }
 0x26a   : > { %v1205_v29 = vmul.f32 %v2756_v13, %v1178_v62  ;;  %1555 = vmatprep.mubr.msk.f32.mxu1 %vm1022_vm0, %v1246_v0  ;;  %v1110_v10 = vpop.xlane.xlu1 %1109  ;;  %v1054_v3 = vpop.xlane.xlu0 %1053  ;;  %v1204_v17 = vmul.f32 %v2753_v48, %v1177_v6  ;;  %v1152_v37 = vsub.f32 %v2626_v28, %v2745_v7  ;;  %v1154_v28 = vsub.f32 %v2646_v57, %v2766_v4 }
 0x26b   : > { %v1798_v21 = vpop.eup %1797  ;;  %v1164_v25 = vadd.f32 1e-05, %v1140_v40  ;;  %v1133_v47 = vsub.f32 %v1117_v2, %v1125_v30  ;;  %v2791_v27 = vmul.f32 0.0052083335, %v1054_v3  ;;  %1356 = vmatmul.mubr.f32.vlgmr.msra.gmra.mrb[16].mxu1 %v1245_v5  ;;  %v1118_v35 = vmul.f32 0.0052083335, %v1110_v10 }
 0x26c   : > { %v1179_v32 = vmul.f32 %v1798_v21, %v1147_v8  ;;  %v1180_v61 = vmul.f32 %v1798_v21, %v1148_v9  ;;  %v1232_v58 = vadd.f32 %v2764_v31, %v1205_v29  ;;  %v1231_v63 = vadd.f32 %v2761_v20, %v1204_v17 }
 0x26d   : > { %1803 = vrsqrt.f32 %v1164_v25  ;;  %v1141_v39 = vmax.f32 %v1133_v47, 0.0  ;;  %v1126_v19 = vmul.f32 %v2791_v27, %v2791_v27  ;;  %v1153_v8 = vsub.f32 %v2635_v49, %v2766_v4 }
 0x26e   : > { %v1207_v60 = vmul.f32 %v2756_v13, %v1180_v61  ;;  %v1248_v11 = vmax.f32 %v1232_v58, 0.0  ;;  %v1247_v24 = vmax.f32 %v1231_v63, 0.0  ;;  %v1206_v22 = vmul.f32 %v2753_v48, %v1179_v32 }
 0x26f   : > { %v1800_v41 = vpop.eup %1799  ;;  %v1165_v1 = vadd.f32 1e-05, %v1141_v39  ;;  %v1134_v18 = vsub.f32 %v1118_v35, %v1126_v19  ;;  %v1155_v57 = vsub.f32 %v2655_v12, %v2778_v59  ;;  %v1156_v4 = vsub.f32 %v2666_v15, %v2778_v59 }
 0x270   : > { %v1181_v42 = vmul.f32 %v1800_v41, %v1149_v23  ;;  %v1182_v43 = vmul.f32 %v1800_v41, %v1150_v14  ;;  %1556 = vmatprep.mubr.msk.f32.mxu1 %vm1022_vm0, %v1248_v11  ;;  %v1234_v26 = vadd.f32 %v2764_v31, %v1207_v60  ;;  %v1233_v16 = vadd.f32 %v2761_v20, %v1206_v22 }
 0x271   : > { %1805 = vrsqrt.f32 %v1165_v1  ;;  %v1142_v34 = vmax.f32 %v1134_v18, 0.0  ;;  %1361 = vmatmul.mubr.f32.gmra.mrb[18].mxu1 %v1247_v24  ;;  %v1157_v12 = vsub.f32 %v2678_v36, %v2791_v27  ;;  %v1158_v15 = vsub.f32 %v2689_v38, %v2791_v27 }
 0x272   : > { %v1209_v52 = vmul.f32 %v2756_v13, %v1182_v43  ;;  %v1250_v6 = vmax.f32 %v1234_v26, 0.0  ;;  %v1208_v62 = vmul.f32 %v2753_v48, %v1181_v42  ;;  %v1249_v40 = vmax.f32 %v1233_v16, 0.0 }
 0x273   : > { %v1802_v0 = vpop.eup %1801  ;;  %v1166_v5 = vadd.f32 1e-05, %v1142_v34 }
 0x274   : > { %v1183_v2 = vmul.f32 %v1802_v0, %v1151_v44  ;;  %v1184_v30 = vmul.f32 %v1802_v0, %v1152_v37  ;;  %1557 = vmatprep.mubr.msk.f32.mxu1 %vm1022_vm0, %v1250_v6  ;;  %v1236_v33 = vadd.f32 %v2764_v31, %v1209_v52  ;;  %v1235_v29 = vadd.f32 %v2761_v20, %v1208_v62 }
 0x275   : > { %1807 = vrsqrt.f32 %v1166_v5  ;;  %1366 = vmatmul.mubr.f32.gmra.mrb[20].mxu1 %v1249_v40 }
 0x276   : > { %v1211_v7 = vmul.f32 %v2756_v13, %v1184_v30  ;;  %v1252_v9 = vmax.f32 %v1236_v33, 0.0  ;;  %v1251_v10 = vmax.f32 %v1235_v29, 0.0  ;;  %v1210_v3 = vmul.f32 %v2753_v48, %v1183_v2 }
 0x277   : > { %v1804_v17 = vpop.eup %1803 }
 0x278   : > { %v1185_v21 = vmul.f32 %v1804_v17, %v1153_v8  ;;  %v1186_v23 = vmul.f32 %v1804_v17, %v1154_v28  ;;  %1558 = vmatprep.mubr.msk.f32.mxu1 %vm1022_vm0, %v1252_v9  ;;  %v1238_v25 = vadd.f32 %v2764_v31, %v1211_v7  ;;  %v1237_v49 = vadd.f32 %v2761_v20, %v1210_v3 }
 0x279   : > { %1371 = vmatmul.mubr.f32.gmra.mrb[22].mxu1 %v1251_v10 }
 0x27a   : > { %v1213_v47 = vmul.f32 %v2756_v13, %v1186_v23  ;;  %v1254_v32 = vmax.f32 %v1238_v25, 0.0  ;;  %v1253_v61 = vmax.f32 %v1237_v49, 0.0  ;;  %v1212_v58 = vmul.f32 %v2753_v48, %v1185_v21 }
 0x27b   : > { %v1806_v63 = vpop.eup %1805 }
 0x27c   : > { %v1187_v39 = vmul.f32 %v1806_v63, %v1155_v57  ;;  %v1188_v35 = vmul.f32 %v1806_v63, %v1156_v4  ;;  %1559 = vmatprep.mubr.msk.f32.mxu1 %vm1022_vm0, %v1254_v32  ;;  %v1240_v19 = vadd.f32 %v2764_v31, %v1213_v47  ;;  %v1239_v60 = vadd.f32 %v2761_v20, %v1212_v58 }
 0x27d   : > { %1376 = vmatmul.mubr.f32.gmra.mrb[24].mxu1 %v1253_v61 }
 0x27e   : > { %v1215_v59 = vmul.f32 %v2756_v13, %v1188_v35  ;;  %v1256_v14 = vmax.f32 %v1240_v19, 0.0  ;;  %v1255_v11 = vmax.f32 %v1239_v60, 0.0  ;;  %v1214_v24 = vmul.f32 %v2753_v48, %v1187_v39 }
 0x27f   : > { %v1808_v41 = vpop.eup %1807 }
 0x280   : > { %v1189_v1 = vmul.f32 %v1808_v41, %v1157_v12  ;;  %v1190_v18 = vmul.f32 %v1808_v41, %v1158_v15  ;;  %1560 = vmatprep.mubr.msk.f32.mxu1 %vm1022_vm0, %v1256_v14  ;;  %v1242_v22 = vadd.f32 %v2764_v31, %v1215_v59  ;;  %v1241_v42 = vadd.f32 %v2761_v20, %v1214_v24 }
 0x281   : > { %1381 = vmatmul.mubr.f32.gmra.mrb[26].mxu1 %v1255_v11 }
 0x282   : > { %v1217_v36 = vmul.f32 %v2756_v13, %v1190_v18  ;;  %v1258_v38 = vmax.f32 %v1242_v22, 0.0  ;;  %v1257_v27 = vmax.f32 %v1241_v42, 0.0  ;;  %v1216_v43 = vmul.f32 %v2753_v48, %v1189_v1  ;;  %v1554_v13 = vld [vmem:[%s2929_s9] ss:$0 sm:$0xff] }
 0x284   : > { %1561 = vmatprep.mubr.msk.f32.mxu1 %vm1022_vm0, %v1258_v38  ;;  %v1244_v26 = vadd.f32 %v2764_v31, %v1217_v36  ;;  %v1243_v44 = vadd.f32 %v2761_v20, %v1216_v43 }
 0x285   : > { %1386 = vmatmul.mubr.f32.gmra.mrb[28].mxu1 %v1257_v27 }
 0x286   : > { %v1260_v34 = vmax.f32 %v1244_v26, 0.0  ;;  %v1259_v16 = vmax.f32 %v1243_v44, 0.0 }
 0x288   : > { %1562 = vmatprep.mubr.msk.f32.mxu1 %vm1022_vm0, %v1260_v34 }
 0x289   : > { %1391 = vmatmul.mubr.f32.gmra.mrb[30].mxu1 %v1259_v16 }
 0x33e   : > { %v1357_v52 = vpop.f32.mrb[16].mxu1 }
 0x33f   : > { %v1358_v37 = vadd.f32 %v1554_v13, %v1357_v52  ;;  %v1359_v6 = vpop.f32.mrb[17].mxu1 }
 0x341   : > { %v1396_v48 = vadd.f32 %v1358_v37, %v2463_v45 }
 0x343   : > { %1404 = vst [vmem:[%s2852_s12] sm:$0xff] %v1396_v48 }
 0x344   : > { %v1362_v20 = vpop.f32.mrb[18].mxu1 }
 0x345   : > { %v1363_v31 = vadd.f32 %v1554_v13, %v1362_v20  ;;  %v1364_v62 = vpop.f32.mrb[19].mxu1 }
 0x347   : > { %v1397_v0 = vadd.f32 %v1363_v31, %v2472_v46 }
 0x348   : > { %v1367_v5 = vpop.f32.mrb[20].mxu1 }
 0x349   : > { %1405 = vst [vmem:[%s2852_s12 + $0x8] sm:$0xff] %v1397_v0  ;;  %v1368_v40 = vadd.f32 %v1554_v13, %v1367_v5  ;;  %v1369_v2 = vpop.f32.mrb[21].mxu1 }
 0x34b   : > { %v1398_v45 = vadd.f32 %v1368_v40, %v2480_v51 }
 0x34c   : > { %v1372_v30 = vpop.f32.mrb[22].mxu1 }
 0x34d   : > { %1406 = vst [vmem:[%s2852_s12 + $0x10] sm:$0xff] %v1398_v45  ;;  %v1373_v33 = vadd.f32 %v1554_v13, %v1372_v30  ;;  %v1374_v29 = vpop.f32.mrb[23].mxu1 }
 0x34f   : > { %v1399_v8 = vadd.f32 %v1373_v33, %v2488_v53 }
 0x350   : > { %v1377_v28 = vpop.f32.mrb[24].mxu1 }
 0x351   : > { %1407 = vst [vmem:[%s2852_s12 + $0x18] sm:$0xff] %v1399_v8  ;;  %v1378_v7 = vadd.f32 %v1554_v13, %v1377_v28  ;;  %v1379_v46 = vpop.f32.mrb[25].mxu1 }
 0x353   : > { %v1400_v9 = vadd.f32 %v1378_v7, %v2496_v54 }
 0x354   : > { %v1382_v10 = vpop.f32.mrb[26].mxu1 }
 0x355   : > { %1408 = vst [vmem:[%s2852_s12 + $0x20] sm:$0xff] %v1400_v9  ;;  %v1383_v3 = vadd.f32 %v1554_v13, %v1382_v10  ;;  %v1384_v51 = vpop.f32.mrb[27].mxu1 }
 0x357   : > { %v1401_v17 = vadd.f32 %v1383_v3, %v2501_v55 }
 0x358   : > { %v1387_v21 = vpop.f32.mrb[28].mxu1 }
 0x359   : > { %1409 = vst [vmem:[%s2852_s12 + $0x28] sm:$0xff] %v1401_v17  ;;  %v1388_v23 = vadd.f32 %v1554_v13, %v1387_v21  ;;  %v1389_v53 = vpop.f32.mrb[29].mxu1 }
 0x35b   : > { %v1402_v25 = vadd.f32 %v1388_v23, %v2506_v56 }
 0x35c   : > { %v1392_v49 = vpop.f32.mrb[30].mxu1 }
 0x35d   : > { %1410 = vst [vmem:[%s2852_s12 + $0x30] sm:$0xff] %v1402_v25  ;;  %v1393_v54 = vadd.f32 %v1554_v13, %v1392_v49  ;;  %v1394_v57 = vpop.f32.mrb[31].mxu1 }
 0x35f   : > { %v1403_v55 = vadd.f32 %v1393_v54, %v2511_v50 }
 0x361   : > { %1411 = vst [vmem:[%s2852_s12 + $0x38] sm:$0xff] %v1403_v55 }
 0x362   : > { %1852 = shalt.err (!%p1849_p4)
}
 0x363   : > { %s1853_s28 = scalar_lea.hbm %s2874_s11, 1024  ;;  %s1857_s21 = scalar_lea.hbm %s2930_s10, 2048 }
 0x364   : > { %p1854_p5 = scmp.ne.s32.totalorder %s2874_s11, %s1853_s28  ;;  %p1858_p1 = scmp.lt.u32.totalorder %s2874_s11, %s2930_s10 }
 0x365   : > { %p1859_p3 = scmp.lt.u32.totalorder %s1857_s21, %s1853_s28  ;;  %p1861_p6 = scmp.lt.u32.totalorder %s1853_s28, %s2874_s11 }
 0x366   : > { %p1855_p7 = pnand %p1854_p5, %p2942_p12 }
 0x367   : > { %p1860_p11 = por %p1859_p3, %p1858_p1 }
 0x368   : > { %p1856_p9 = pneg %p1855_p7 }
 0x369   : > { %p1862_p13 = por %p1861_p6, %p1860_p11 }
 0x36b   : > { %p1863_p8 = pnand %p1862_p13, %p1856_p9 }
 0x36d   : > { %1866 = shalt.err (!%p1863_p8)
}
 0x36e   : > { %s1916_s30 = smov 128   ;;  %s1917_s17 = smov 8  }
 0x36f   : > { %1736 = dma.vmem_to_hbm [thread:$0]  (%p2942_p12), %s2868_s20, 1024, %s2874_s11, %s1413_s27, %s1916_s30, %s1916_s30, %s1917_s17  }
 0x370 PF: > { %s1441_s29 = sand.u32 1, %s1893_s13   ;;  %p2943_p10 = scmp.ne.s32.totalorder %s2938_s26, 0 }
 0x371   : > { %p2944_p0 = scmp.ge.s32.totalorder %s1905_s16, 2  ;;  %s1442_s23 = scalar_lea.sflag [#allocation4], %s1441_s29 }
 0x373   : > { %p1743_p2 = pnand %p2944_p0, %p2943_p10 }
 0x375   : > { %1888 = dma.done.wait (!%p1743_p2), %s1442_s23, 1024  }
 0x376   : > { %1890 = vsyncadd (!%p1743_p2), %s1442_s23, 4294966272  ;;  %s2945_s28 = sld [smem:[#allocation8_spill]]  ;;  %p23_p4 = scmp.ge.s32.totalorder %s1998_s19, 4  }
 0x377   : > { %s2946_s13 = smov %s1897_s14  ;;  %s2947_s14 = smov %s1901_s15 }
 0x378   : > { %s2949_s16 = smov %s1998_s19  ;;  %25 = sbr.rel (!%p23_p4) target bundleno = 7 (0x7), region = 108 }
 0x37c   : > { %s2948_s15 = smov %s2945_s28 }
 0x37f   :  { %1447 = vsyncpa [#allocation3], 1 }
 0x380   :  { %1449 = vsyncpa [#allocation3 + $0x1], 1 }
 0x381   :  { %1450 = vsyncpa [#allocation4], 1 }
 0x382   :  { %1452 = vsyncpa [#allocation4 + $0x1], 1 }

</bundles_post_ra>
